<compile_context>
chip_gen: v7x
topology: tpu7x:2x2x1
jax: 0.10.0
libtpu: 0.0.40
codegen_flags: <defaults>
</compile_context>

<pallas_src>
import jax
import jax.numpy as jnp
import numpy as np
from jax.experimental import pallas as pl
from jax.experimental.pallas import tpu as pltpu


def _round_up(n, m):
    return ((n + m - 1) // m) * m


# --------------------------------------------------------------------------- #
# Kernel
# --------------------------------------------------------------------------- #
def topology_kernel(x_ref, w1_ref, wx_ref, wh_ref, b1_ref, ball_ref, out_ref):
    # x arrives in its native dtype; cast on the VPU (hidden under the DMA).
    x = x_ref[...].astype(w1_ref.dtype)                                # [tn, fin]

    # filtration hidden layer (hid zero-padded to 128 lanes; padded lanes stay 0)
    h = jnp.maximum(
        jnp.dot(x, w1_ref[...], preferred_element_type=jnp.float32) + b1_ref[...],
        0.0)                                                           # [tn, hid_pad] f32

    # x-part of the output Linear + all folded constants (coord funcs, biases)
    out = jnp.dot(x, wx_ref[...], preferred_element_type=jnp.float32) + ball_ref[...]

    # node-dependent coord-function contribution, folded into a single matmul
    out = out + jnp.dot(h.astype(wh_ref.dtype), wh_ref[...],
                        preferred_element_type=jnp.float32)

    out_ref[...] = jnp.maximum(out, 0.0).astype(out_ref.dtype)         # final ReLU


# --------------------------------------------------------------------------- #
# Host-side parameter folding / padding (PyTorch layout -> kernel layout)
# --------------------------------------------------------------------------- #
def prepare_kernel_params(P, *, dtype=jnp.bfloat16, lane=128):
    """Fold fake-persistence coord functions into the output Linear (exact algebra).

    Valid ONLY for: fake persistence (birth == death), shared filtration params,
    tanh_filtrations=False, dim1=False, residual_and_bn=False.
    """
    hid, fin = P["W1"].shape
    nf = P["W2"].shape[0]
    n_tri = P["tri_t"].shape[0]
    n_line = P["line_W"].shape[0]
    fout = P["Wout"].shape[0]
    total = n_tri + n_line
    # Guard: the fold silently breaks if the concat layout changes.
    assert P["Wout"].shape[1] == fin + nf * total
    assert P["line_W"].shape[1] == 2

    hid_pad = _round_up(hid, lane)

    WoutT = P["Wout"].T                                   # [fin + nf*total, fout]
    Wx = WoutT[:fin]                                      # [fin, fout]
    Wc = WoutT[fin:].reshape(nf, total, fout)
    wout_tri = Wc[:, :n_tri, :]                           # [nf, n_tri, fout]
    wout_line = Wc[:, n_tri:, :]                          # [nf, n_line, fout]

    # birth == death  =>  line_f = fv_f * (w_birth + w_death) + line_b, tri = relu(t)
    s = P["line_W"].sum(axis=1)                           # [n_line]
    V = jnp.einsum("l,flo->fo", s, wout_line)             # [nf, fout]
    const_tri = jnp.einsum("t,fto->o", jax.nn.relu(P["tri_t"]), wout_tri)   # [fout]
    const_line = jnp.einsum("l,flo->o", P["line_b"], wout_line)             # [fout]
    b_all = P["bout"] + P["b2"] @ V + const_tri + const_line                # [fout]

    Wh = P["W2"].T @ V                                    # [hid, fout]
    w1 = P["W1"].T                                        # [fin, hid]

    # zero-pad the hidden dim to 128 lanes (padded h lanes are exactly zero and
    # hit zero rows of Wh); output weights stay at native fout width.
    w1p = jnp.zeros((fin, hid_pad), jnp.float32).at[:, :hid].set(w1)
    Whp = jnp.zeros((hid_pad, fout), jnp.float32).at[:hid, :].set(Wh)
    b1p = jnp.zeros((1, hid_pad), jnp.float32).at[0, :hid].set(P["b1"])

    return {
        "w1": w1p.astype(dtype),                 # [fin, hid_pad]
        "wx": Wx.astype(dtype),                  # [fin, fout]
        "wh": Whp.astype(dtype),                 # [hid_pad, fout]
        "b1": b1p,                               # [1, hid_pad] f32
        "ball": jnp.asarray(b_all, jnp.float32).reshape(1, fout),  # [1, fout] f32
        "hid_pad": hid_pad,
        "fout": fout,
    }


# --------------------------------------------------------------------------- #
# Wrapper
# --------------------------------------------------------------------------- #
def topology_layer_forward(x, kp, *, tile_n=1024):
    """x: [N, fin] (native dtype). Returns out: [N, fout] f32
    (== relu(Linear([x | coord_act])))."""
    N, fin = x.shape
    hid_pad = kp["hid_pad"]
    fout = kp["fout"]
    wdtype = kp["w1"].dtype

    # Tile: multiple of 8, at most tile_n, and no larger than ceil(N/2) so the
    # single "parallel" grid axis has >= 2 steps (v7x has 2 TensorCores; on
    # v5e/v6e the extra step is one ~0.35us overhead, negligible).
    half = _round_up(max(pl.cdiv(N, 2), 8), 8)
    tile = max(8, min(_round_up(int(tile_n), 8), half))
    grid = (pl.cdiv(N, tile),)     # ragged last block: extra rows discarded on store

    wbytes = jnp.dtype(wdtype).itemsize
    flops = 2 * N * (fin * hid_pad + fin * fout + hid_pad * fout)
    bytes_accessed = (N * fin * x.dtype.itemsize            # x read
                      + N * fout * 4                        # out write (f32)
                      + (fin * hid_pad + fin * fout + hid_pad * fout) * wbytes
                      + (hid_pad + fout) * 4)               # biases

    out = pl.pallas_call(
        topology_kernel,
        out_shape=jax.ShapeDtypeStruct((N, fout), jnp.float32),
        grid_spec=pltpu.PrefetchScalarGridSpec(
            num_scalar_prefetch=0,
            grid=grid,
            in_specs=[
                pl.BlockSpec((tile, fin), lambda i: (i, 0)),       # x (native dtype)
                pl.BlockSpec((fin, hid_pad), lambda i: (0, 0)),    # W1 (padded)
                pl.BlockSpec((fin, fout), lambda i: (0, 0)),       # Wx
                pl.BlockSpec((hid_pad, fout), lambda i: (0, 0)),   # Wh (folded)
                pl.BlockSpec((1, hid_pad), lambda i: (0, 0)),      # b1
                pl.BlockSpec((1, fout), lambda i: (0, 0)),         # folded bias
            ],
            out_specs=pl.BlockSpec((tile, fout), lambda i: (i, 0)),
        ),
        compiler_params=pltpu.CompilerParams(dimension_semantics=("parallel",)),
        cost_estimate=pl.CostEstimate(flops=flops, transcendentals=0,
                                      bytes_accessed=bytes_accessed),
    )(x, kp["w1"], kp["wx"], kp["wh"], kp["b1"], kp["ball"])

    return out


# --------------------------------------------------------------------------- #
# Plain-JAX mirror of the PyTorch forward (unfolded, same op ordering / concat)
# --------------------------------------------------------------------------- #
def reference_forward(x, P):
    h = jax.nn.relu(x @ P["W1"].T + P["b1"])
    fv = h @ P["W2"].T + P["b2"]                                     # [N, nf]
    coords = []
    for f in range(fv.shape[1]):
        pers = jnp.stack([fv[:, f], fv[:, f]], axis=-1)              # fake persistence0
        tri = jax.nn.relu(P["tri_t"][None, :]
                          - jnp.abs(pers[:, 1] - pers[:, 0])[:, None])
        line = pers @ P["line_W"].T + P["line_b"]
        coords.append(jnp.concatenate([tri, line], axis=1))
    coord_act = jnp.concatenate(coords, axis=1)
    cc = jnp.concatenate([x, coord_act], axis=1)
    return jax.nn.relu(cc @ P["Wout"].T + P["bout"])


if __name__ == "__main__":
    # small shapes consistent with the module (graph node-feature matrix)
    N, fin, fout = 1000, 32, 16          # N not a tile multiple -> exercises ragged block
    hid, nf = 24, 4
    n_tri, n_line = 3, 5                 # num_coord_funs = {Triangle: 3, Line: 5}

    key = jax.random.PRNGKey(0)
    ks = jax.random.split(key, 10)
    norm = lambda k, s: (0.1 * jax.random.normal(k, s)).astype(jnp.float32)

    # PyTorch-layout parameters (deterministic init)
    P = {
        "W1": norm(ks[0], (hid, fin)),   "b1": norm(ks[1], (hid,)),
        "W2": norm(ks[2], (nf, hid)),    "b2": norm(ks[3], (nf,)),
        "tri_t": norm(ks[4], (n_tri,)),
        "line_W": norm(ks[5], (n_line, 2)), "line_b": norm(ks[6], (n_line,)),
        "Wout": norm(ks[7], (fout, fin + nf * (n_tri + n_line))),
        "bout": norm(ks[8], (fout,)),
    }
    x = norm(ks[9], (N, fin))

    ref = reference_forward(x, P)

    # 1) f32 params: validates the host-side algebraic fold (tolerance covers the
    #    TPU default-precision f32 matmul emulation; a fold bug would be O(1e-1)).
    kp32 = prepare_kernel_params(P, dtype=jnp.float32)
    out32 = jax.block_until_ready(topology_layer_forward(x, kp32))
    np.testing.assert_allclose(np.asarray(out32), np.asarray(ref), rtol=2e-3, atol=2e-3)

    # 2) bf16 fast path (f32 MXU accumulation, f32 biases)
    kp16 = prepare_kernel_params(P, dtype=jnp.bfloat16)
    out16 = jax.block_until_ready(topology_layer_forward(x, kp16))
    np.testing.assert_allclose(np.asarray(out16), np.asarray(ref), rtol=2e-2, atol=1e-2)

    print("KERNEL_OK")
</pallas_src>

<mosaic_0001>
module attributes {stable_mosaic.version = 11 : i64} {
  func.func @topology_kernel(%arg0: i32, %arg1: memref<504x32xf32, #tpu.memory_space<vmem>>, %arg2: memref<32x128xf32, #tpu.memory_space<vmem>>, %arg3: memref<32x16xf32, #tpu.memory_space<vmem>>, %arg4: memref<128x16xf32, #tpu.memory_space<vmem>>, %arg5: memref<1x128xf32, #tpu.memory_space<vmem>>, %arg6: memref<1x16xf32, #tpu.memory_space<vmem>>, %arg7: memref<504x16xf32, #tpu.memory_space<vmem>>) attributes {dimension_semantics = [#tpu.dimension_semantics<parallel>], iteration_bounds = array<i64: 2>, scalar_prefetch = 0 : i64, scratch_operands = 0 : i64, tpu.core_type = #tpu.core_type<tc>, window_params = [{transform_indices = @transform_0, window_bounds = array<i64: 504, 32>}, {pipeline_mode = #tpu.pipeline_mode<synchronous>, transform_indices = @transform_1, window_bounds = array<i64: 32, 128>}, {pipeline_mode = #tpu.pipeline_mode<synchronous>, transform_indices = @transform_2, window_bounds = array<i64: 32, 16>}, {pipeline_mode = #tpu.pipeline_mode<synchronous>, transform_indices = @transform_3, window_bounds = array<i64: 128, 16>}, {pipeline_mode = #tpu.pipeline_mode<synchronous>, transform_indices = @transform_4, window_bounds = array<i64: 1, 128>}, {pipeline_mode = #tpu.pipeline_mode<synchronous>, transform_indices = @transform_5, window_bounds = array<i64: 1, 16>}, {transform_indices = @transform_6, window_bounds = array<i64: 504, 16>}]} {
    %c0 = arith.constant 0 : index
    %c0_0 = arith.constant 0 : index
    %0 = vector.load %arg1[%c0, %c0_0] : memref<504x32xf32, #tpu.memory_space<vmem>>, vector<504x32xf32>
    %c0_1 = arith.constant 0 : index
    %c0_2 = arith.constant 0 : index
    %1 = vector.load %arg2[%c0_1, %c0_2] : memref<32x128xf32, #tpu.memory_space<vmem>>, vector<32x128xf32>
    %cst = arith.constant dense<0.000000e+00> : vector<504x128xf32>
    %2 = tpu.matmul %0, %1, %cst {dimension_numbers = #tpu.dot_dimension_numbers<[1], [0], [0], [1], [0, 0, 1, 1], [], []>} : vector<504x32xf32>, vector<32x128xf32>, vector<504x128xf32> -> vector<504x128xf32>
    %c0_3 = arith.constant 0 : index
    %c0_4 = arith.constant 0 : index
    %3 = vector.load %arg5[%c0_3, %c0_4] : memref<1x128xf32, #tpu.memory_space<vmem>>, vector<1x128xf32>
    %4 = vector.broadcast %3 : vector<1x128xf32> to vector<504x128xf32>
    %5 = arith.addf %2, %4 : vector<504x128xf32>
    %cst_5 = arith.constant 0.000000e+00 : f32
    %6 = vector.broadcast %cst_5 : f32 to vector<504x128xf32>
    %7 = arith.maximumf %5, %6 : vector<504x128xf32>
    %c0_6 = arith.constant 0 : index
    %c0_7 = arith.constant 0 : index
    %8 = vector.load %arg3[%c0_6, %c0_7] : memref<32x16xf32, #tpu.memory_space<vmem>>, vector<32x16xf32>
    %cst_8 = arith.constant dense<0.000000e+00> : vector<504x16xf32>
    %9 = tpu.matmul %0, %8, %cst_8 {dimension_numbers = #tpu.dot_dimension_numbers<[1], [0], [0], [1], [0, 0, 1, 1], [], []>} : vector<504x32xf32>, vector<32x16xf32>, vector<504x16xf32> -> vector<504x16xf32>
    %c0_9 = arith.constant 0 : index
    %c0_10 = arith.constant 0 : index
    %10 = vector.load %arg6[%c0_9, %c0_10] : memref<1x16xf32, #tpu.memory_space<vmem>>, vector<1x16xf32>
    %11 = vector.broadcast %10 : vector<1x16xf32> to vector<504x16xf32>
    %12 = arith.addf %9, %11 : vector<504x16xf32>
    %c0_11 = arith.constant 0 : index
    %c0_12 = arith.constant 0 : index
    %13 = vector.load %arg4[%c0_11, %c0_12] : memref<128x16xf32, #tpu.memory_space<vmem>>, vector<128x16xf32>
    %cst_13 = arith.constant dense<0.000000e+00> : vector<504x16xf32>
    %14 = tpu.matmul %7, %13, %cst_13 {dimension_numbers = #tpu.dot_dimension_numbers<[1], [0], [0], [1], [0, 0, 1, 1], [], []>} : vector<504x128xf32>, vector<128x16xf32>, vector<504x16xf32> -> vector<504x16xf32>
    %15 = arith.addf %12, %14 : vector<504x16xf32>
    %cst_14 = arith.constant 0.000000e+00 : f32
    %16 = vector.broadcast %cst_14 : f32 to vector<504x16xf32>
    %17 = arith.maximumf %15, %16 : vector<504x16xf32>
    %c0_15 = arith.constant 0 : index
    %c0_16 = arith.constant 0 : index
    %18 = vector.load %arg7[%c0_15, %c0_16] : memref<504x16xf32, #tpu.memory_space<vmem>>, vector<504x16xf32>
    tpu.vector_store %arg7[%c0_15, %c0_16], %17 {strides = array<i32>} : memref<504x16xf32, #tpu.memory_space<vmem>>, vector<504x16xf32>,
    return
  }
  func.func @transform_0(%arg0: i32) -> (i32, i32) {
    %c0_i32 = arith.constant 0 : i32
    %c0_i32_0 = arith.constant 0 : i32
    return %arg0, %c0_i32 : i32, i32
  }
  func.func @transform_1(%arg0: i32) -> (i32, i32) {
    %c0_i32 = arith.constant 0 : i32
    %c0_i32_0 = arith.constant 0 : i32
    %c0_i32_1 = arith.constant 0 : i32
    return %c0_i32, %c0_i32_0 : i32, i32
  }
  func.func @transform_2(%arg0: i32) -> (i32, i32) {
    %c0_i32 = arith.constant 0 : i32
    %c0_i32_0 = arith.constant 0 : i32
    %c0_i32_1 = arith.constant 0 : i32
    return %c0_i32, %c0_i32_0 : i32, i32
  }
  func.func @transform_3(%arg0: i32) -> (i32, i32) {
    %c0_i32 = arith.constant 0 : i32
    %c0_i32_0 = arith.constant 0 : i32
    %c0_i32_1 = arith.constant 0 : i32
    return %c0_i32, %c0_i32_0 : i32, i32
  }
  func.func @transform_4(%arg0: i32) -> (i32, i32) {
    %c0_i32 = arith.constant 0 : i32
    %c0_i32_0 = arith.constant 0 : i32
    %c0_i32_1 = arith.constant 0 : i32
    return %c0_i32, %c0_i32_0 : i32, i32
  }
  func.func @transform_5(%arg0: i32) -> (i32, i32) {
    %c0_i32 = arith.constant 0 : i32
    %c0_i32_0 = arith.constant 0 : i32
    %c0_i32_1 = arith.constant 0 : i32
    return %c0_i32, %c0_i32_0 : i32, i32
  }
  func.func @transform_6(%arg0: i32) -> (i32, i32) {
    %c0_i32 = arith.constant 0 : i32
    %c0_i32_0 = arith.constant 0 : i32
    return %arg0, %c0_i32 : i32, i32
  }
}

</mosaic_0001>

<bundles_post_ra>
// kernel: tpu_custom_call.1
= control target key start
LH: loop header
LB: loop body
LE: loop exit
PB: predicated region body
PF: predicated region fallthrough
CT: control target
= control target key end

     0   :  { %s3817_s21 = smov 0   ;;  %s3819_s22 = smov 0   ;;  %s5318_s0 = inlined_call_operand.vmem [shape: f32[1000,32], index: 0, kind: input, shape index: {}]   ;;  %s5319_s1 = inlined_call_operand.vmem [shape: f32[32,128], index: 1, kind: input, shape index: {}]   ;;  %s5320_s2 = inlined_call_operand.vmem [shape: f32[32,16], index: 2, kind: input, shape index: {}]   ;;  %s5321_s3 = inlined_call_operand.vmem [shape: f32[128,16], index: 3, kind: input, shape index: {}]   ;;  %s5322_s4 = inlined_call_operand.vmem [shape: f32[1,128], index: 4, kind: input, shape index: {}]   ;;  %s5323_s5 = inlined_call_operand.vmem [shape: f32[1,16], index: 5, kind: input, shape index: {}]   ;;  %s5324_s6 = inlined_call_operand.vmem [shape: f32[1000,16], index: 6, kind: output, shape index: {}]  }
   0x1   :  { %s3821_s23 = smov 0  }
   0x2 LB: > { %s3830_s24 = sadd.s32 4294967295, %s3745_s23   ;;  %s3832_s25 = sadd.s32 1, %s3745_s23   ;;  %s3745_s23 = sphi %s3821_s23, %s5333_s23   ;;  %s3741_s22 = sphi %s3819_s22, %s5332_s22   ;;  %s3737_s21 = sphi %s3817_s21, %s5331_s21  }
   0x3   : > { %s151_s26 = ssub.s32 %s3745_s23, %s3832_s25  ;;  %s154_s27 = sadd.s32 1, %s3741_s22 }
   0x4   : > { %p152_p0 = scmp.eq.s32.totalorder %s151_s26, 0  ;;  %p164_p1 = scmp.ne.s32.totalorder %s3741_s22, %s3737_s21 }
   0x5   : > { %p165_p2 = scmp.eq.s32.totalorder %s3830_s24, 1  ;;  %p2425_p3 = scmp.ge.s32.totalorder %s3745_s23, 1 }
   0x6   : > { %s3840_s28 = scalar_select %p152_p0, %s3741_s22, %s154_s27  }
   0x7   : > { %p3842_p4 = por %p165_p2, %p164_p1  ;;  %p221_p5 = scmp.lt.s32.totalorder %s3745_s23, 3 }
   0x9   : > { %p222_p6 = pnand %p2425_p3, %p221_p5 }
   0xa   : > { %v336_v0 = vld [vmem:[%s5319_s1] sm:$0xff] (!%p222_p6)  ;;  %v337_v1 = vld [vmem:[%s5319_s1 + $0x8] sm:$0xff] (!%p222_p6)  ;;  %v338_v2 = vld [vmem:[%s5319_s1 + $0x10] sm:$0xff] (!%p222_p6)  ;;  %v3779_v3 = vmov (!%p222_p6), 0.0|0.0   ;;  %vm3780_vm0 = vmmov (!%p222_p6), 0   ;;  %v3781_v6 = vmov (!%p222_p6), 0.0  }
   0xb   : > { %225 = sbr.rel (%p222_p6) target bundleno = 788 (0x314), region = 44  ;;  %3396 = vmatprep.subr.bf16.mxu0 (!%p222_p6), %v3779_v3  ;;  %v3397_v4 = vpack.c.bf16 (!%p222_p6), %v337_v1, %v336_v0  ;;  %v339_v5 = vld [vmem:[%s5319_s1 + $0x18] sm:$0xff] (!%p222_p6)  ;;  %2789 = vmatprep.mubr.msk.f32.mxu0 (!%p222_p6), %vm3780_vm0, %v3781_v6  ;;  %v980_v7 = vld [vmem:[%s5320_s2] sm:$0xff] (!%p222_p6)  ;;  %v981_v8 = vld [vmem:[%s5320_s2 + $0x8] sm:$0xff] (!%p222_p6)  ;;  %vm347_vm1 = vcmask (!%p222_p6), 261120   ;;  %s251_s11 = sand.u32 (!%p222_p6), 1, %s3737_s21  }
   0xc   : > { %s3862_s14 = smul.u32 (!%p222_p6), 63, %s3830_s24  ;;  %3432 = vmatprep.subr.bf16.mxu1 (!%p222_p6), %v3779_v3  ;;  %v3403_v9 = vpack.c.bf16 (!%p222_p6), %v981_v8, %v980_v7  ;;  %v982_v10 = vld [vmem:[%s5320_s2 + $0x10] sm:$0xff] (!%p222_p6)  ;;  %v983_v11 = vld [vmem:[%s5320_s2 + $0x18] sm:$0xff] (!%p222_p6)  ;;  %3079 = vmatprep.mubr.msk.f32.mxu1 (!%p222_p6), %vm3780_vm0, %v3781_v6  ;;  %v3400_v12 = vpack.c.bf16 (!%p222_p6), %v339_v5, %v338_v2  ;;  %v1371_v16 = vld [vmem:[%s5321_s3] sm:$0xff] (!%p222_p6)  ;;  %vm1893_vm2 = vcmask (!%p222_p6), 130048  }
   0xd   : > { %3398 = vmatpush3.bf16.msra.mxu0 (!%p222_p6), %v3397_v4  ;;  %v3406_v13 = vpack.c.bf16 (!%p222_p6), %v983_v11, %v982_v10  ;;  %v1372_v17 = vld [vmem:[%s5321_s3 + $0x8] sm:$0xff] (!%p222_p6)  ;;  %v1373_v21 = vld [vmem:[%s5321_s3 + $0x10] sm:$0xff] (!%p222_p6)  ;;  %v1374_v22 = vld [vmem:[%s5321_s3 + $0x18] sm:$0xff] (!%p222_p6)  ;;  %s3594_s15 = smul.u32 (!%p222_p6), 504, %s251_s11 }
   0xe   : > { %p259_p7 = scmp.lt.s32.totalorder (!%p222_p6), %s3862_s14, 124  ;;  %3399 = vmatprep.subr.bf16.mxu0 (!%p222_p6), %v3779_v3  ;;  %3434 = vmatpush3.bf16.msra.mxu1 (!%p222_p6), %v3403_v9  ;;  %v3409_v18 = vpack.c.bf16 (!%p222_p6), %v1372_v17, %v1371_v16  ;;  %v3412_v25 = vpack.c.bf16 (!%p222_p6), %v1374_v22, %v1373_v21  ;;  %v1375_v26 = vld [vmem:[%s5321_s3 + $0x20] sm:$0xff] (!%p222_p6)  ;;  %v1376_v27 = vld [vmem:[%s5321_s3 + $0x28] sm:$0xff] (!%p222_p6)  ;;  %v1377_v31 = vld [vmem:[%s5321_s3 + $0x30] sm:$0xff] (!%p222_p6) }
   0xf   : > { %3433 = vmatprep.subr.bf16.mxu1 (!%p222_p6), %v3779_v3  ;;  %v3415_v30 = vpack.c.bf16 (!%p222_p6), %v1376_v27, %v1375_v26  ;;  %v1378_v32 = vld [vmem:[%s5321_s3 + $0x38] sm:$0xff] (!%p222_p6)  ;;  %v1379_v39 = vld [vmem:[%s5321_s3 + $0x40] sm:$0xff] (!%p222_p6)  ;;  %v1380_v40 = vld [vmem:[%s5321_s3 + $0x48] sm:$0xff] (!%p222_p6)  ;;  %s4860_s21 = scalar_lea.vmem (!%p222_p6), [#allocation2], %s3594_s15  }
  0x10   : > { %v3418_v35 = vpack.c.bf16 (!%p222_p6), %v1378_v32, %v1377_v31  ;;  %v3421_v42 = vpack.c.bf16 (!%p222_p6), %v1380_v40, %v1379_v39  ;;  %v1381_v50 = vld [vmem:[%s5321_s3 + $0x50] sm:$0xff] (!%p222_p6)  ;;  %v1382_v51 = vld [vmem:[%s5321_s3 + $0x58] sm:$0xff] (!%p222_p6)  ;;  %v1383_v61 = vld [vmem:[%s5321_s3 + $0x60] sm:$0xff] (!%p222_p6) }
  0x11   : > { %3401 = vmatpush3.bf16.msra.mxu0 (!%p222_p6), %v3400_v12  ;;  %v3424_v53 = vpack.c.bf16 (!%p222_p6), %v1382_v51, %v1381_v50  ;;  %v1384_v62 = vld [vmem:[%s5321_s3 + $0x68] sm:$0xff] (!%p222_p6)  ;;  %v1386_v10 = vld [vmem:[%s5321_s3 + $0x78] sm:$0xff] (!%p222_p6) }
  0x12   : > { %s260_s27 = scalar_select %p259_p7, %s3862_s14, 124  ;;  %3435 = vmatpush3.bf16.msra.mxu1 %v3406_v13  ;;  %3402 = vmatprep.subr.bf16.mxu0 %v3779_v3  ;;  %v3427_v0 = vpack.c.bf16 %v1384_v62, %v1383_v61 }
  0x13   : > { %3408 = vmatprep.subr.bf16.mxu1 %v3779_v3  ;;  %s1965_s16 = ssub.s32 (%p3842_p4), 125, %s3862_s14  ;;  %s2567_s17 = smul.u32 (%p3842_p4), 504, %s3830_s24 }
  0x14   : > { %s2426_s30 = sshll.u32 %s260_s27, 3  ;;  %p1966_p8 = scmp.lt.s32.totalorder (%p3842_p4), %s1965_s16, 63 }
  0x15   : > { %s3886_s9 = scalar_lea.vmem %s5318_s0, %s2426_s30  ;;  %s5126_s20 = scalar_lea.vmem (%p3842_p4), %s5324_s6, %s2567_s17  }
  0x16   : > { %v3890_v14 = vld [vmem:[%s3886_s9] sm:$0xff]  ;;  %v3898_v15 = vld [vmem:[%s3886_s9 + $0x8] sm:$0xff]  ;;  %v3912_v19 = vld [vmem:[%s3886_s9 + $0x10] sm:$0xff] }
  0x17   : > { %2790 = vmatmul.mubr.msk.f32.vlgmr.msra.gmra.mrb[0].mxu0 %vm347_vm1, %v3890_v14  ;;  %v3915_v20 = vld [vmem:[%s3886_s9 + $0xf8] sm:$0xff]  ;;  %v3928_v23 = vld [vmem:[%s3886_s9 + $0x100] sm:$0xff]  ;;  %v3951_v28 = vld [vmem:[%s3886_s9 + $0x108] sm:$0xff] }
  0x18   : > { %2792 = vmatprep.mubr.msk.f32.mxu0 %vm3780_vm0, %v3781_v6  ;;  %3404 = vmatpush3.bf16.msra.mxu0 %v3403_v9  ;;  %v3933_v24 = vld [vmem:[%s3886_s9 + $0x18] sm:$0xff]  ;;  %v3956_v29 = vld [vmem:[%s3886_s9 + $0x20] sm:$0xff]  ;;  %v3972_v33 = vld [vmem:[%s3886_s9 + $0x110] sm:$0xff] }
  0x19   : > { %3405 = vmatprep.subr.bf16.mxu0 %v3779_v3  ;;  %3080 = vmatmul.mubr.msk.f32.vlgmr.msra.gmra.mrb[0].mxu1 %vm347_vm1, %v3915_v20  ;;  %v3977_v34 = vld [vmem:[%s3886_s9 + $0x28] sm:$0xff]  ;;  %v3987_v36 = vld [vmem:[%s3886_s9 + $0x118] sm:$0xff]  ;;  %v3992_v37 = vld [vmem:[%s3886_s9 + $0x30] sm:$0xff] }
  0x1a   : > { %3410 = vmatpush3.bf16.msra.mxu1 %v3409_v18  ;;  %3082 = vmatprep.mubr.msk.f32.mxu1 %vm3780_vm0, %v3781_v6  ;;  %v4002_v38 = vld [vmem:[%s3886_s9 + $0x120] sm:$0xff]  ;;  %v4013_v41 = vld [vmem:[%s3886_s9 + $0x38] sm:$0xff]  ;;  %v4022_v43 = vld [vmem:[%s3886_s9 + $0x128] sm:$0xff] }
  0x1b   : > { %2793 = vmatmul.mubr.msk.f32.gmra.mrb[2].mxu0 %vm347_vm1, %v3898_v15  ;;  %3411 = vmatprep.subr.bf16.mxu1 %v3779_v3  ;;  %v4027_v44 = vld [vmem:[%s3886_s9 + $0x40] sm:$0xff]  ;;  %v4037_v45 = vld [vmem:[%s3886_s9 + $0x130] sm:$0xff]  ;;  %v4042_v46 = vld [vmem:[%s3886_s9 + $0x48] sm:$0xff] }
  0x1c   : > { %2795 = vmatprep.mubr.msk.f32.mxu0 %vm3780_vm0, %v3781_v6  ;;  %3407 = vmatpush3.bf16.msra.mxu0 %v3406_v13  ;;  %v4051_v47 = vld [vmem:[%s3886_s9 + $0x138] sm:$0xff]  ;;  %v4056_v48 = vld [vmem:[%s3886_s9 + $0x50] sm:$0xff]  ;;  %v4065_v49 = vld [vmem:[%s3886_s9 + $0x140] sm:$0xff] }
  0x1d   : > { %3083 = vmatmul.mubr.msk.f32.gmra.mrb[2].mxu1 %vm347_vm1, %v3928_v23  ;;  %v4076_v52 = vld [vmem:[%s3886_s9 + $0x58] sm:$0xff]  ;;  %v4085_v54 = vld [vmem:[%s3886_s9 + $0x148] sm:$0xff]  ;;  %v4090_v55 = vld [vmem:[%s3886_s9 + $0x60] sm:$0xff] }
  0x1e   : > { %3085 = vmatprep.mubr.msk.f32.mxu1 %vm3780_vm0, %v3781_v6  ;;  %3413 = vmatpush3.bf16.msra.mxu1 %v3412_v25  ;;  %v4100_v56 = vld [vmem:[%s3886_s9 + $0x150] sm:$0xff]  ;;  %v4105_v57 = vld [vmem:[%s3886_s9 + $0x68] sm:$0xff]  ;;  %v4114_v58 = vld [vmem:[%s3886_s9 + $0x158] sm:$0xff] }
  0x1f   : > { %2796 = vmatmul.mubr.msk.f32.gmra.mrb[4].mxu0 %vm347_vm1, %v3912_v19  ;;  %3414 = vmatprep.subr.bf16.mxu1 %v3779_v3  ;;  %v4119_v59 = vld [vmem:[%s3886_s9 + $0x70] sm:$0xff]  ;;  %v4128_v60 = vld [vmem:[%s3886_s9 + $0x160] sm:$0xff]  ;;  %v4139_v63 = vld [vmem:[%s3886_s9 + $0x78] sm:$0xff] }
  0x20   : > { %2798 = vmatprep.mubr.msk.f32.mxu0 %vm3780_vm0, %v3781_v6  ;;  %v4148_v1 = vld [vmem:[%s3886_s9 + $0x168] sm:$0xff]  ;;  %v4153_v2 = vld [vmem:[%s3886_s9 + $0x80] sm:$0xff]  ;;  %v4163_v4 = vld [vmem:[%s3886_s9 + $0x170] sm:$0xff] }
  0x21   : > { %3086 = vmatmul.mubr.msk.f32.gmra.mrb[4].mxu1 %vm347_vm1, %v3951_v28  ;;  %v4168_v5 = vld [vmem:[%s3886_s9 + $0x88] sm:$0xff]  ;;  %v4182_v7 = vld [vmem:[%s3886_s9 + $0x90] sm:$0xff]  ;;  %v4191_v8 = vld [vmem:[%s3886_s9 + $0x180] sm:$0xff] }
  0x22   : > { %3088 = vmatprep.mubr.msk.f32.mxu1 %vm3780_vm0, %v3781_v6  ;;  %3416 = vmatpush3.bf16.msra.mxu1 %v3415_v30  ;;  %v1385_v9 = vld [vmem:[%s5321_s3 + $0x70] sm:$0xff]  ;;  %v4202_v11 = vld [vmem:[%s3886_s9 + $0x98] sm:$0xff]  ;;  %v4211_v13 = vld [vmem:[%s3886_s9 + $0x188] sm:$0xff] }
  0x23   : > { %2799 = vmatmul.mubr.msk.f32.gmra.mrb[6].mxu0 %vm347_vm1, %v3933_v24  ;;  %3417 = vmatprep.subr.bf16.mxu1 %v3779_v3  ;;  %v3430_v12 = vpack.c.bf16 %v1386_v10, %v1385_v9  ;;  %v4216_v16 = vld [vmem:[%s3886_s9 + $0xa0] sm:$0xff]  ;;  %v4225_v17 = vld [vmem:[%s3886_s9 + $0x190] sm:$0xff]  ;;  %v4230_v18 = vld [vmem:[%s3886_s9 + $0xa8] sm:$0xff] }
  0x24   : > { %2801 = vmatprep.mubr.msk.f32.mxu0 %vm3780_vm0, %v3781_v6  ;;  %v4239_v21 = vld [vmem:[%s3886_s9 + $0x198] sm:$0xff]  ;;  %v4244_v22 = vld [vmem:[%s3886_s9 + $0xb0] sm:$0xff]  ;;  %v4253_v25 = vld [vmem:[%s3886_s9 + $0x1a0] sm:$0xff] }
  0x25   : > { %3089 = vmatmul.mubr.msk.f32.gmra.mrb[6].mxu1 %vm347_vm1, %v3972_v33  ;;  %v4258_v26 = vld [vmem:[%s3886_s9 + $0xb8] sm:$0xff]  ;;  %v4267_v27 = vld [vmem:[%s3886_s9 + $0x1a8] sm:$0xff]  ;;  %v4272_v30 = vld [vmem:[%s3886_s9 + $0xc0] sm:$0xff] }
  0x26   : > { %3091 = vmatprep.mubr.msk.f32.mxu1 %vm3780_vm0, %v3781_v6  ;;  %3419 = vmatpush3.bf16.msra.mxu1 %v3418_v35  ;;  %v4281_v31 = vld [vmem:[%s3886_s9 + $0x1b0] sm:$0xff]  ;;  %v4286_v32 = vld [vmem:[%s3886_s9 + $0xc8] sm:$0xff]  ;;  %v4295_v35 = vld [vmem:[%s3886_s9 + $0x1b8] sm:$0xff] }
  0x27   : > { %2802 = vmatmul.mubr.msk.f32.gmra.mrb[8].mxu0 %vm347_vm1, %v3956_v29  ;;  %3420 = vmatprep.subr.bf16.mxu1 %v3779_v3  ;;  %v4300_v39 = vld [vmem:[%s3886_s9 + $0xd0] sm:$0xff]  ;;  %v4309_v40 = vld [vmem:[%s3886_s9 + $0x1c0] sm:$0xff]  ;;  %v4323_v50 = vld [vmem:[%s3886_s9 + $0x1c8] sm:$0xff] }
  0x28   : > { %2804 = vmatprep.mubr.msk.f32.mxu0 %vm3780_vm0, %v3781_v6  ;;  %v4328_v51 = vld [vmem:[%s3886_s9 + $0xe0] sm:$0xff]  ;;  %v4342_v61 = vld [vmem:[%s3886_s9 + $0xe8] sm:$0xff]  ;;  %v4351_v62 = vld [vmem:[%s3886_s9 + $0x1d8] sm:$0xff] }
  0x29   : > { %3092 = vmatmul.mubr.msk.f32.gmra.mrb[8].mxu1 %vm347_vm1, %v3987_v36  ;;  %v4365_v9 = vld [vmem:[%s3886_s9 + $0x1e0] sm:$0xff]  ;;  %v4376_v10 = vld [vmem:[%s3886_s9 + $0x1e8] sm:$0xff] }
  0x2a   : > { %3094 = vmatprep.mubr.msk.f32.mxu1 %vm3780_vm0, %v3781_v6  ;;  %3422 = vmatpush3.bf16.msra.mxu1 %v3421_v42  ;;  %v4314_v42 = vld [vmem:[%s3886_s9 + $0xd8] sm:$0xff] }
  0x2b   : > { %2805 = vmatmul.mubr.msk.f32.gmra.mrb[10].mxu0 %vm347_vm1, %v3977_v34  ;;  %3423 = vmatprep.subr.bf16.mxu1 %v3779_v3 }
  0x2c   : > { %2807 = vmatprep.mubr.msk.f32.mxu0 %vm3780_vm0, %v3781_v6 }
  0x2d   : > { %3095 = vmatmul.mubr.msk.f32.gmra.mrb[10].mxu1 %vm347_vm1, %v4002_v38 }
  0x2e   : > { %3097 = vmatprep.mubr.msk.f32.mxu1 %vm3780_vm0, %v3781_v6  ;;  %3425 = vmatpush3.bf16.msra.mxu1 %v3424_v53  ;;  %v4337_v53 = vld [vmem:[%s3886_s9 + $0x1d0] sm:$0xff] }
  0x2f   : > { %2808 = vmatmul.mubr.msk.f32.gmra.mrb[12].mxu0 %vm347_vm1, %v3992_v37  ;;  %3426 = vmatprep.subr.bf16.mxu1 %v3779_v3 }
  0x30   : > { %2810 = vmatprep.mubr.msk.f32.mxu0 %vm3780_vm0, %v3781_v6 }
  0x31   : > { %3098 = vmatmul.mubr.msk.f32.gmra.mrb[12].mxu1 %vm347_vm1, %v4022_v43 }
  0x32   : > { %3100 = vmatprep.mubr.msk.f32.mxu1 %vm3780_vm0, %v3781_v6  ;;  %3428 = vmatpush3.bf16.msra.mxu1 %v3427_v0  ;;  %v4356_v0 = vld [vmem:[%s3886_s9 + $0xf0] sm:$0xff] }
  0x33   : > { %2811 = vmatmul.mubr.msk.f32.gmra.mrb[14].mxu0 %vm347_vm1, %v4013_v41  ;;  %3429 = vmatprep.subr.bf16.mxu1 %v3779_v3  ;;  %v4177_v3 = vld [vmem:[%s3886_s9 + $0x178] sm:$0xff] }
  0x34   : > { %2813 = vmatprep.mubr.msk.f32.mxu0 %vm3780_vm0, %v3781_v6 }
  0x35   : > { %3101 = vmatmul.mubr.msk.f32.gmra.mrb[14].mxu1 %vm347_vm1, %v4037_v45 }
  0x36   : > { %3103 = vmatprep.mubr.msk.f32.mxu1 %vm3780_vm0, %v3781_v6  ;;  %3431 = vmatpush3.bf16.msra.mxu1 %v3430_v12  ;;  %v4387_v12 = vld [vmem:[%s3886_s9 + $0x1f0] sm:$0xff] }
  0x37   : > { %2814 = vmatmul.mubr.msk.f32.gmra.mrb[16].mxu0 %vm347_vm1, %v4027_v44 }
  0x38   : > { %2816 = vmatprep.mubr.msk.f32.mxu0 %vm3780_vm0, %v3781_v6 }
  0x39   : > { %3104 = vmatmul.mubr.msk.f32.gmra.mrb[16].mxu1 %vm347_vm1, %v4051_v47 }
  0x3a   : > { %3106 = vmatprep.mubr.msk.f32.mxu1 %vm3780_vm0, %v3781_v6 }
  0x3b   : > { %2817 = vmatmul.mubr.msk.f32.gmra.mrb[18].mxu0 %vm347_vm1, %v4042_v46 }
  0x3c   : > { %2819 = vmatprep.mubr.msk.f32.mxu0 %vm3780_vm0, %v3781_v6 }
  0x3d   : > { %3107 = vmatmul.mubr.msk.f32.gmra.mrb[18].mxu1 %vm347_vm1, %v4065_v49 }
  0x3e   : > { %3109 = vmatprep.mubr.msk.f32.mxu1 %vm3780_vm0, %v3781_v6 }
  0x3f   : > { %2820 = vmatmul.mubr.msk.f32.gmra.mrb[20].mxu0 %vm347_vm1, %v4056_v48 }
  0x40   : > { %2822 = vmatprep.mubr.msk.f32.mxu0 %vm3780_vm0, %v3781_v6 }
  0x41   : > { %3110 = vmatmul.mubr.msk.f32.gmra.mrb[20].mxu1 %vm347_vm1, %v4085_v54 }
  0x42   : > { %3112 = vmatprep.mubr.msk.f32.mxu1 %vm3780_vm0, %v3781_v6 }
  0x43   : > { %2823 = vmatmul.mubr.msk.f32.gmra.mrb[22].mxu0 %vm347_vm1, %v4076_v52 }
  0x44   : > { %2825 = vmatprep.mubr.msk.f32.mxu0 %vm3780_vm0, %v3781_v6 }
  0x45   : > { %3113 = vmatmul.mubr.msk.f32.gmra.mrb[22].mxu1 %vm347_vm1, %v4100_v56 }
  0x46   : > { %3115 = vmatprep.mubr.msk.f32.mxu1 %vm3780_vm0, %v3781_v6 }
  0x47   : > { %2826 = vmatmul.mubr.msk.f32.gmra.mrb[24].mxu0 %vm347_vm1, %v4090_v55 }
  0x48   : > { %2828 = vmatprep.mubr.msk.f32.mxu0 %vm3780_vm0, %v3781_v6 }
  0x49   : > { %3116 = vmatmul.mubr.msk.f32.gmra.mrb[24].mxu1 %vm347_vm1, %v4114_v58 }
  0x4a   : > { %3118 = vmatprep.mubr.msk.f32.mxu1 %vm3780_vm0, %v3781_v6 }
  0x4b   : > { %2829 = vmatmul.mubr.msk.f32.gmra.mrb[26].mxu0 %vm347_vm1, %v4105_v57 }
  0x4c   : > { %2831 = vmatprep.mubr.msk.f32.mxu0 %vm3780_vm0, %v3781_v6 }
  0x4d   : > { %3119 = vmatmul.mubr.msk.f32.gmra.mrb[26].mxu1 %vm347_vm1, %v4128_v60 }
  0x4e   : > { %3121 = vmatprep.mubr.msk.f32.mxu1 %vm3780_vm0, %v3781_v6 }
  0x4f   : > { %2832 = vmatmul.mubr.msk.f32.gmra.mrb[28].mxu0 %vm347_vm1, %v4119_v59 }
  0x50   : > { %2834 = vmatprep.mubr.msk.f32.mxu0 %vm3780_vm0, %v3781_v6 }
  0x51   : > { %3122 = vmatmul.mubr.msk.f32.gmra.mrb[28].mxu1 %vm347_vm1, %v4148_v1 }
  0x52   : > { %3124 = vmatprep.mubr.msk.f32.mxu1 %vm3780_vm0, %v3781_v6 }
  0x53   : > { %2835 = vmatmul.mubr.msk.f32.gmra.mrb[30].mxu0 %vm347_vm1, %v4139_v63 }
  0x54   : > { %2837 = vmatprep.mubr.msk.f32.mxu0 %vm3780_vm0, %v3781_v6 }
  0x55   : > { %3125 = vmatmul.mubr.msk.f32.gmra.mrb[30].mxu1 %vm347_vm1, %v4163_v4 }
  0x56   : > { %3127 = vmatprep.mubr.msk.f32.mxu1 %vm3780_vm0, %v3781_v6 }
  0x57   : > { %2838 = vmatmul.mubr.msk.f32.gmra.mrb[32].mxu0 %vm347_vm1, %v4153_v2 }
  0x58   : > { %2840 = vmatprep.mubr.msk.f32.mxu0 %vm3780_vm0, %v3781_v6 }
  0x59   : > { %3128 = vmatmul.mubr.msk.f32.gmra.mrb[32].mxu1 %vm347_vm1, %v4177_v3 }
  0x5a   : > { %3130 = vmatprep.mubr.msk.f32.mxu1 %vm3780_vm0, %v3781_v6 }
  0x5b   : > { %2841 = vmatmul.mubr.msk.f32.gmra.mrb[34].mxu0 %vm347_vm1, %v4168_v5 }
  0x5c   : > { %2843 = vmatprep.mubr.msk.f32.mxu0 %vm3780_vm0, %v3781_v6 }
  0x5d   : > { %3131 = vmatmul.mubr.msk.f32.gmra.mrb[34].mxu1 %vm347_vm1, %v4191_v8 }
  0x5e   : > { %3133 = vmatprep.mubr.msk.f32.mxu1 %vm3780_vm0, %v3781_v6 }
  0x5f   : > { %2844 = vmatmul.mubr.msk.f32.gmra.mrb[36].mxu0 %vm347_vm1, %v4182_v7 }
  0x60   : > { %2846 = vmatprep.mubr.msk.f32.mxu0 %vm3780_vm0, %v3781_v6 }
  0x61   : > { %3134 = vmatmul.mubr.msk.f32.gmra.mrb[36].mxu1 %vm347_vm1, %v4211_v13 }
  0x62   : > { %3136 = vmatprep.mubr.msk.f32.mxu1 %vm3780_vm0, %v3781_v6 }
  0x63   : > { %2847 = vmatmul.mubr.msk.f32.gmra.mrb[38].mxu0 %vm347_vm1, %v4202_v11 }
  0x64   : > { %2849 = vmatprep.mubr.msk.f32.mxu0 %vm3780_vm0, %v3781_v6 }
  0x65   : > { %3137 = vmatmul.mubr.msk.f32.gmra.mrb[38].mxu1 %vm347_vm1, %v4225_v17 }
  0x66   : > { %3139 = vmatprep.mubr.msk.f32.mxu1 %vm3780_vm0, %v3781_v6 }
  0x67   : > { %2850 = vmatmul.mubr.msk.f32.gmra.mrb[40].mxu0 %vm347_vm1, %v4216_v16 }
  0x68   : > { %2852 = vmatprep.mubr.msk.f32.mxu0 %vm3780_vm0, %v3781_v6 }
  0x69   : > { %3140 = vmatmul.mubr.msk.f32.gmra.mrb[40].mxu1 %vm347_vm1, %v4239_v21 }
  0x6a   : > { %3142 = vmatprep.mubr.msk.f32.mxu1 %vm3780_vm0, %v3781_v6 }
  0x6b   : > { %2853 = vmatmul.mubr.msk.f32.gmra.mrb[42].mxu0 %vm347_vm1, %v4230_v18 }
  0x6c   : > { %2855 = vmatprep.mubr.msk.f32.mxu0 %vm3780_vm0, %v3781_v6 }
  0x6d   : > { %3143 = vmatmul.mubr.msk.f32.gmra.mrb[42].mxu1 %vm347_vm1, %v4253_v25 }
  0x6e   : > { %3145 = vmatprep.mubr.msk.f32.mxu1 %vm3780_vm0, %v3781_v6 }
  0x6f   : > { %2856 = vmatmul.mubr.msk.f32.gmra.mrb[44].mxu0 %vm347_vm1, %v4244_v22 }
  0x70   : > { %2858 = vmatprep.mubr.msk.f32.mxu0 %vm3780_vm0, %v3781_v6 }
  0x71   : > { %3146 = vmatmul.mubr.msk.f32.gmra.mrb[44].mxu1 %vm347_vm1, %v4267_v27 }
  0x72   : > { %3148 = vmatprep.mubr.msk.f32.mxu1 %vm3780_vm0, %v3781_v6 }
  0x73   : > { %2859 = vmatmul.mubr.msk.f32.gmra.mrb[46].mxu0 %vm347_vm1, %v4258_v26 }
  0x74   : > { %2861 = vmatprep.mubr.msk.f32.mxu0 %vm3780_vm0, %v3781_v6 }
  0x75   : > { %3149 = vmatmul.mubr.msk.f32.gmra.mrb[46].mxu1 %vm347_vm1, %v4281_v31 }
  0x76   : > { %3151 = vmatprep.mubr.msk.f32.mxu1 %vm3780_vm0, %v3781_v6 }
  0x77   : > { %2862 = vmatmul.mubr.msk.f32.gmra.mrb[48].mxu0 %vm347_vm1, %v4272_v30 }
  0x78   : > { %2864 = vmatprep.mubr.msk.f32.mxu0 %vm3780_vm0, %v3781_v6 }
  0x79   : > { %3152 = vmatmul.mubr.msk.f32.gmra.mrb[48].mxu1 %vm347_vm1, %v4295_v35 }
  0x7a   : > { %3154 = vmatprep.mubr.msk.f32.mxu1 %vm3780_vm0, %v3781_v6 }
  0x7b   : > { %2865 = vmatmul.mubr.msk.f32.gmra.mrb[50].mxu0 %vm347_vm1, %v4286_v32 }
  0x7c   : > { %2867 = vmatprep.mubr.msk.f32.mxu0 %vm3780_vm0, %v3781_v6 }
  0x7d   : > { %3155 = vmatmul.mubr.msk.f32.gmra.mrb[50].mxu1 %vm347_vm1, %v4309_v40 }
  0x7e   : > { %3157 = vmatprep.mubr.msk.f32.mxu1 %vm3780_vm0, %v3781_v6 }
  0x7f   : > { %2868 = vmatmul.mubr.msk.f32.gmra.mrb[52].mxu0 %vm347_vm1, %v4300_v39 }
  0x80   : > { %2870 = vmatprep.mubr.msk.f32.mxu0 %vm3780_vm0, %v3781_v6 }
  0x81   : > { %3158 = vmatmul.mubr.msk.f32.gmra.mrb[52].mxu1 %vm347_vm1, %v4323_v50 }
  0x82   : > { %3160 = vmatprep.mubr.msk.f32.mxu1 %vm3780_vm0, %v3781_v6 }
  0x83   : > { %2871 = vmatmul.mubr.msk.f32.gmra.mrb[54].mxu0 %vm347_vm1, %v4314_v42 }
  0x84   : > { %2873 = vmatprep.mubr.msk.f32.mxu0 %vm3780_vm0, %v3781_v6 }
  0x85   : > { %3161 = vmatmul.mubr.msk.f32.gmra.mrb[54].mxu1 %vm347_vm1, %v4337_v53 }
  0x86   : > { %3163 = vmatprep.mubr.msk.f32.mxu1 %vm3780_vm0, %v3781_v6 }
  0x87   : > { %2874 = vmatmul.mubr.msk.f32.gmra.mrb[56].mxu0 %vm347_vm1, %v4328_v51 }
  0x88   : > { %2876 = vmatprep.mubr.msk.f32.mxu0 %vm3780_vm0, %v3781_v6 }
  0x89   : > { %3164 = vmatmul.mubr.msk.f32.gmra.mrb[56].mxu1 %vm347_vm1, %v4351_v62 }
  0x8a   : > { %3166 = vmatprep.mubr.msk.f32.mxu1 %vm3780_vm0, %v3781_v6 }
  0x8b   : > { %2877 = vmatmul.mubr.msk.f32.gmra.mrb[58].mxu0 %vm347_vm1, %v4342_v61 }
  0x8c   : > { %2879 = vmatprep.mubr.msk.f32.mxu0 %vm3780_vm0, %v3781_v6 }
  0x8d   : > { %3167 = vmatmul.mubr.msk.f32.gmra.mrb[58].mxu1 %vm347_vm1, %v4365_v9 }
  0x8e   : > { %3169 = vmatprep.mubr.msk.f32.mxu1 %vm3780_vm0, %v3781_v6 }
  0x8f   : > { %2880 = vmatmul.mubr.msk.f32.gmra.mrb[60].mxu0 %vm347_vm1, %v4356_v0 }
  0x90   : > { %2882 = vmatprep.mubr.msk.f32.mxu0 %vm3780_vm0, %v3781_v6 }
  0x91   : > { %3170 = vmatmul.mubr.msk.f32.gmra.mrb[60].mxu1 %vm347_vm1, %v4376_v10 }
  0x92   : > { %3172 = vmatprep.mubr.msk.f32.mxu1 %vm3780_vm0, %v3781_v6 }
  0x93   : > { %2883 = vmatmul.mubr.msk.f32.gmra.mrb[62].mxu0 %vm347_vm1, %v3915_v20  ;;  %v4476_v20 = vld [vmem:[%s5322_s4] ss:$0 sm:$0xff] }
  0x94   : > { %2885 = vmatprep.mubr.msk.f32.mxu0 %vm3780_vm0, %v3781_v6 }
  0x95   : > { %3173 = vmatmul.mubr.msk.f32.gmra.mrb[62].mxu1 %vm347_vm1, %v4387_v12 }
  0x96   : > { %3207 = vmatprep.mubr.msk.f32.mxu1 %vm3780_vm0, %v3781_v6 }
  0x97   : > { %2886 = vmatmul.mubr.msk.f32.gmra.mrb[64].mxu0 %vm347_vm1, %v3928_v23 }
  0x98   : > { %2888 = vmatprep.mubr.msk.f32.mxu0 %vm3780_vm0, %v3781_v6 }
  0x9b   : > { %2889 = vmatmul.mubr.msk.f32.gmra.mrb[66].mxu0 %vm347_vm1, %v3951_v28 }
  0x9c   : > { %2891 = vmatprep.mubr.msk.f32.mxu0 %vm3780_vm0, %v3781_v6 }
  0x9f   : > { %2892 = vmatmul.mubr.msk.f32.gmra.mrb[68].mxu0 %vm347_vm1, %v3972_v33 }
  0xa0   : > { %2894 = vmatprep.mubr.msk.f32.mxu0 %vm3780_vm0, %v3781_v6 }
  0xa3   : > { %2895 = vmatmul.mubr.msk.f32.gmra.mrb[70].mxu0 %vm347_vm1, %v3987_v36 }
  0xa4   : > { %2897 = vmatprep.mubr.msk.f32.mxu0 %vm3780_vm0, %v3781_v6 }
  0xa7   : > { %2898 = vmatmul.mubr.msk.f32.gmra.mrb[72].mxu0 %vm347_vm1, %v4002_v38 }
  0xa8   : > { %2900 = vmatprep.mubr.msk.f32.mxu0 %vm3780_vm0, %v3781_v6 }
  0xab   : > { %2901 = vmatmul.mubr.msk.f32.gmra.mrb[74].mxu0 %vm347_vm1, %v4022_v43 }
  0xac   : > { %2903 = vmatprep.mubr.msk.f32.mxu0 %vm3780_vm0, %v3781_v6 }
  0xaf   : > { %2904 = vmatmul.mubr.msk.f32.gmra.mrb[76].mxu0 %vm347_vm1, %v4037_v45 }
  0xb0   : > { %2906 = vmatprep.mubr.msk.f32.mxu0 %vm3780_vm0, %v3781_v6 }
  0xb3   : > { %2907 = vmatmul.mubr.msk.f32.gmra.mrb[78].mxu0 %vm347_vm1, %v4051_v47 }
  0xb4   : > { %2909 = vmatprep.mubr.msk.f32.mxu0 %vm3780_vm0, %v3781_v6 }
  0xb7   : > { %2910 = vmatmul.mubr.msk.f32.gmra.mrb[80].mxu0 %vm347_vm1, %v4065_v49 }
  0xb8   : > { %2912 = vmatprep.mubr.msk.f32.mxu0 %vm3780_vm0, %v3781_v6 }
  0xbb   : > { %2913 = vmatmul.mubr.msk.f32.gmra.mrb[82].mxu0 %vm347_vm1, %v4085_v54 }
  0xbc   : > { %2915 = vmatprep.mubr.msk.f32.mxu0 %vm3780_vm0, %v3781_v6 }
  0xbf   : > { %2916 = vmatmul.mubr.msk.f32.gmra.mrb[84].mxu0 %vm347_vm1, %v4100_v56 }
  0xc0   : > { %2918 = vmatprep.mubr.msk.f32.mxu0 %vm3780_vm0, %v3781_v6 }
  0xc3   : > { %2919 = vmatmul.mubr.msk.f32.gmra.mrb[86].mxu0 %vm347_vm1, %v4114_v58 }
  0xc4   : > { %2921 = vmatprep.mubr.msk.f32.mxu0 %vm3780_vm0, %v3781_v6 }
  0xc7   : > { %2922 = vmatmul.mubr.msk.f32.gmra.mrb[88].mxu0 %vm347_vm1, %v4128_v60 }
  0xc8   : > { %2924 = vmatprep.mubr.msk.f32.mxu0 %vm3780_vm0, %v3781_v6 }
  0xcb   : > { %2925 = vmatmul.mubr.msk.f32.gmra.mrb[90].mxu0 %vm347_vm1, %v4148_v1 }
  0xcc   : > { %2927 = vmatprep.mubr.msk.f32.mxu0 %vm3780_vm0, %v3781_v6 }
  0xcf   : > { %2928 = vmatmul.mubr.msk.f32.gmra.mrb[92].mxu0 %vm347_vm1, %v4163_v4 }
  0xd0   : > { %2930 = vmatprep.mubr.msk.f32.mxu0 %vm3780_vm0, %v3781_v6 }
  0xd3   : > { %2931 = vmatmul.mubr.msk.f32.gmra.mrb[94].mxu0 %vm347_vm1, %v4177_v3 }
  0xd4   : > { %2933 = vmatprep.mubr.msk.f32.mxu0 %vm3780_vm0, %v3781_v6 }
  0xd7   : > { %2934 = vmatmul.mubr.msk.f32.gmra.mrb[96].mxu0 %vm347_vm1, %v4191_v8 }
  0xd8   : > { %2936 = vmatprep.mubr.msk.f32.mxu0 %vm3780_vm0, %v3781_v6 }
  0xdb   : > { %2937 = vmatmul.mubr.msk.f32.gmra.mrb[98].mxu0 %vm347_vm1, %v4211_v13 }
  0xdc   : > { %2939 = vmatprep.mubr.msk.f32.mxu0 %vm3780_vm0, %v3781_v6 }
  0xdf   : > { %2940 = vmatmul.mubr.msk.f32.gmra.mrb[100].mxu0 %vm347_vm1, %v4225_v17 }
  0xe0   : > { %2942 = vmatprep.mubr.msk.f32.mxu0 %vm3780_vm0, %v3781_v6 }
  0xe3   : > { %2943 = vmatmul.mubr.msk.f32.gmra.mrb[102].mxu0 %vm347_vm1, %v4239_v21 }
  0xe4   : > { %2945 = vmatprep.mubr.msk.f32.mxu0 %vm3780_vm0, %v3781_v6 }
  0xe7   : > { %2946 = vmatmul.mubr.msk.f32.gmra.mrb[104].mxu0 %vm347_vm1, %v4253_v25 }
  0xe8   : > { %2948 = vmatprep.mubr.msk.f32.mxu0 %vm3780_vm0, %v3781_v6 }
  0xea   : > { %v603_v23 = vpop.f32.mrb[0].mxu0 }
  0xeb   : > { %v604_v28 = vadd.f32 %v4476_v20, %v603_v23  ;;  %v2791_v33 = vpop.f32.mrb[1].mxu0  ;;  %2949 = vmatmul.mubr.msk.f32.gmra.mrb[106].mxu0 %vm347_vm1, %v4267_v27 }
  0xec   : > { %2951 = vmatprep.mubr.msk.f32.mxu0 %vm3780_vm0, %v3781_v6 }
  0xed   : > { %v917_v36 = vmax.f32 %v604_v28, 0.0 }
  0xee   : > { %v608_v38 = vpop.f32.mrb[2].mxu0 }
  0xef   : > { %v609_v43 = vadd.f32 %v4476_v20, %v608_v38  ;;  %v2794_v45 = vpop.f32.mrb[3].mxu0  ;;  %2952 = vmatmul.mubr.msk.f32.gmra.mrb[108].mxu0 %vm347_vm1, %v4281_v31  ;;  %3208 = vmatmul.mubr.f32.vlgmr.msra.gmra.mrb[64].mxu1 %v917_v36 }
  0xf0   : > { %2954 = vmatprep.mubr.msk.f32.mxu0 %vm3780_vm0, %v3781_v6  ;;  %3210 = vmatprep.mubr.msk.f32.mxu1 %vm3780_vm0, %v3781_v6 }
  0xf1   : > { %v918_v47 = vmax.f32 %v609_v43, 0.0 }
  0xf2   : > { %v613_v49 = vpop.f32.mrb[4].mxu0 }
  0xf3   : > { %v614_v54 = vadd.f32 %v4476_v20, %v613_v49  ;;  %v2797_v56 = vpop.f32.mrb[5].mxu0  ;;  %2955 = vmatmul.mubr.msk.f32.gmra.mrb[110].mxu0 %vm347_vm1, %v4295_v35  ;;  %3211 = vmatmul.mubr.f32.gmra.mrb[66].mxu1 %v918_v47 }
  0xf4   : > { %2957 = vmatprep.mubr.msk.f32.mxu0 %vm3780_vm0, %v3781_v6  ;;  %3213 = vmatprep.mubr.msk.f32.mxu1 %vm3780_vm0, %v3781_v6 }
  0xf5   : > { %v919_v58 = vmax.f32 %v614_v54, 0.0 }
  0xf6   : > { %v618_v60 = vpop.f32.mrb[6].mxu0 }
  0xf7   : > { %v619_v1 = vadd.f32 %v4476_v20, %v618_v60  ;;  %v2800_v4 = vpop.f32.mrb[7].mxu0  ;;  %2958 = vmatmul.mubr.msk.f32.gmra.mrb[112].mxu0 %vm347_vm1, %v4309_v40  ;;  %3214 = vmatmul.mubr.f32.gmra.mrb[68].mxu1 %v919_v58 }
  0xf8   : > { %2960 = vmatprep.mubr.msk.f32.mxu0 %vm3780_vm0, %v3781_v6  ;;  %3216 = vmatprep.mubr.msk.f32.mxu1 %vm3780_vm0, %v3781_v6 }
  0xf9   : > { %v920_v3 = vmax.f32 %v619_v1, 0.0 }
  0xfa   : > { %v623_v8 = vpop.f32.mrb[8].mxu0 }
  0xfb   : > { %v624_v13 = vadd.f32 %v4476_v20, %v623_v8  ;;  %v2803_v17 = vpop.f32.mrb[9].mxu0  ;;  %2961 = vmatmul.mubr.msk.f32.gmra.mrb[114].mxu0 %vm347_vm1, %v4323_v50  ;;  %3217 = vmatmul.mubr.f32.gmra.mrb[70].mxu1 %v920_v3 }
  0xfc   : > { %2963 = vmatprep.mubr.msk.f32.mxu0 %vm3780_vm0, %v3781_v6  ;;  %3219 = vmatprep.mubr.msk.f32.mxu1 %vm3780_vm0, %v3781_v6 }
  0xfd   : > { %v921_v21 = vmax.f32 %v624_v13, 0.0 }
  0xfe   : > { %v628_v25 = vpop.f32.mrb[10].mxu0 }
  0xff   : > { %v629_v27 = vadd.f32 %v4476_v20, %v628_v25  ;;  %v2806_v31 = vpop.f32.mrb[11].mxu0  ;;  %2964 = vmatmul.mubr.msk.f32.gmra.mrb[116].mxu0 %vm347_vm1, %v4337_v53  ;;  %3220 = vmatmul.mubr.f32.gmra.mrb[72].mxu1 %v921_v21 }
 0x100   : > { %2966 = vmatprep.mubr.msk.f32.mxu0 %vm3780_vm0, %v3781_v6  ;;  %3222 = vmatprep.mubr.msk.f32.mxu1 %vm3780_vm0, %v3781_v6 }
 0x101   : > { %v922_v35 = vmax.f32 %v629_v27, 0.0 }
 0x102   : > { %v633_v40 = vpop.f32.mrb[12].mxu0 }
 0x103   : > { %v634_v50 = vadd.f32 %v4476_v20, %v633_v40  ;;  %v2809_v23 = vpop.f32.mrb[13].mxu0  ;;  %2967 = vmatmul.mubr.msk.f32.gmra.mrb[118].mxu0 %vm347_vm1, %v4351_v62  ;;  %3223 = vmatmul.mubr.f32.gmra.mrb[74].mxu1 %v922_v35 }
 0x104   : > { %2969 = vmatprep.mubr.msk.f32.mxu0 %vm3780_vm0, %v3781_v6  ;;  %3225 = vmatprep.mubr.msk.f32.mxu1 %vm3780_vm0, %v3781_v6 }
 0x105   : > { %v923_v53 = vmax.f32 %v634_v50, 0.0 }
 0x106   : > { %v638_v28 = vpop.f32.mrb[14].mxu0 }
 0x107   : > { %v639_v33 = vadd.f32 %v4476_v20, %v638_v28  ;;  %v2812_v36 = vpop.f32.mrb[15].mxu0  ;;  %2970 = vmatmul.mubr.msk.f32.gmra.mrb[120].mxu0 %vm347_vm1, %v4365_v9  ;;  %3226 = vmatmul.mubr.f32.gmra.mrb[76].mxu1 %v923_v53 }
 0x108   : > { %2972 = vmatprep.mubr.msk.f32.mxu0 %vm3780_vm0, %v3781_v6  ;;  %3228 = vmatprep.mubr.msk.f32.mxu1 %vm3780_vm0, %v3781_v6 }
 0x109   : > { %v924_v62 = vmax.f32 %v639_v33, 0.0 }
 0x10a   : > { %v643_v38 = vpop.f32.mrb[16].mxu0 }
 0x10b   : > { %v644_v43 = vadd.f32 %v4476_v20, %v643_v38  ;;  %v2815_v45 = vpop.f32.mrb[17].mxu0  ;;  %2973 = vmatmul.mubr.msk.f32.gmra.mrb[122].mxu0 %vm347_vm1, %v4376_v10  ;;  %3229 = vmatmul.mubr.f32.gmra.mrb[78].mxu1 %v924_v62 }
 0x10c   : > { %2975 = vmatprep.mubr.msk.f32.mxu0 %vm3780_vm0, %v3781_v6  ;;  %3231 = vmatprep.mubr.msk.f32.mxu1 %vm3780_vm0, %v3781_v6 }
 0x10d   : > { %v925_v9 = vmax.f32 %v644_v43, 0.0 }
 0x10e   : > { %v648_v47 = vpop.f32.mrb[18].mxu0 }
 0x10f   : > { %v649_v49 = vadd.f32 %v4476_v20, %v648_v47  ;;  %v2818_v54 = vpop.f32.mrb[19].mxu0  ;;  %2976 = vmatmul.mubr.msk.f32.gmra.mrb[124].mxu0 %vm347_vm1, %v4387_v12  ;;  %3232 = vmatmul.mubr.f32.gmra.mrb[80].mxu1 %v925_v9 }
 0x110   : > { %2986 = vmatprep.mubr.msk.f32.mxu0 %vm3780_vm0, %v3781_v6  ;;  %3234 = vmatprep.mubr.msk.f32.mxu1 %vm3780_vm0, %v3781_v6 }
 0x111   : > { %v926_v10 = vmax.f32 %v649_v49, 0.0 }
 0x112   : > { %v653_v56 = vpop.f32.mrb[20].mxu0 }
 0x113   : > { %v654_v58 = vadd.f32 %v4476_v20, %v653_v56  ;;  %v2821_v60 = vpop.f32.mrb[21].mxu0  ;;  %2987 = vmatmul.mubr.msk.f32.vlgmr.msra.gmra.mrb[126].mxu0 %vm347_vm1, %v3890_v14  ;;  %3235 = vmatmul.mubr.f32.gmra.mrb[82].mxu1 %v926_v10 }
 0x114   : > { %2989 = vmatprep.mubr.msk.f32.mxu0 %vm3780_vm0, %v3781_v6  ;;  %3237 = vmatprep.mubr.msk.f32.mxu1 %vm3780_vm0, %v3781_v6 }
 0x115   : > { %v927_v12 = vmax.f32 %v654_v58, 0.0 }
 0x116   : > { %v658_v1 = vpop.f32.mrb[22].mxu0 }
 0x117   : > { %v659_v4 = vadd.f32 %v4476_v20, %v658_v1  ;;  %v2824_v3 = vpop.f32.mrb[23].mxu0  ;;  %2990 = vmatmul.mubr.msk.f32.gmra.mrb[128].mxu0 %vm347_vm1, %v3898_v15  ;;  %3238 = vmatmul.mubr.f32.gmra.mrb[84].mxu1 %v927_v12 }
 0x118   : > { %2992 = vmatprep.mubr.msk.f32.mxu0 %vm3780_vm0, %v3781_v6  ;;  %3240 = vmatprep.mubr.msk.f32.mxu1 %vm3780_vm0, %v3781_v6 }
 0x119   : > { %v928_v14 = vmax.f32 %v659_v4, 0.0 }
 0x11a   : > { %v663_v8 = vpop.f32.mrb[24].mxu0 }
 0x11b   : > { %v664_v13 = vadd.f32 %v4476_v20, %v663_v8  ;;  %v2827_v17 = vpop.f32.mrb[25].mxu0  ;;  %2993 = vmatmul.mubr.msk.f32.gmra.mrb[130].mxu0 %vm347_vm1, %v3912_v19  ;;  %3241 = vmatmul.mubr.f32.gmra.mrb[86].mxu1 %v928_v14 }
 0x11c   : > { %2995 = vmatprep.mubr.msk.f32.mxu0 %vm3780_vm0, %v3781_v6  ;;  %3243 = vmatprep.mubr.msk.f32.mxu1 %vm3780_vm0, %v3781_v6 }
 0x11d   : > { %v929_v15 = vmax.f32 %v664_v13, 0.0 }
 0x11e   : > { %v668_v21 = vpop.f32.mrb[26].mxu0 }
 0x11f   : > { %v669_v25 = vadd.f32 %v4476_v20, %v668_v21  ;;  %v2830_v27 = vpop.f32.mrb[27].mxu0  ;;  %2996 = vmatmul.mubr.msk.f32.gmra.mrb[132].mxu0 %vm347_vm1, %v3933_v24  ;;  %3244 = vmatmul.mubr.f32.gmra.mrb[88].mxu1 %v929_v15 }
 0x120   : > { %2998 = vmatprep.mubr.msk.f32.mxu0 %vm3780_vm0, %v3781_v6  ;;  %3246 = vmatprep.mubr.msk.f32.mxu1 %vm3780_vm0, %v3781_v6 }
 0x121   : > { %v930_v19 = vmax.f32 %v669_v25, 0.0 }
 0x122   : > { %v673_v31 = vpop.f32.mrb[28].mxu0 }
 0x123   : > { %v674_v35 = vadd.f32 %v4476_v20, %v673_v31  ;;  %v2833_v40 = vpop.f32.mrb[29].mxu0  ;;  %2999 = vmatmul.mubr.msk.f32.gmra.mrb[134].mxu0 %vm347_vm1, %v3956_v29  ;;  %3247 = vmatmul.mubr.f32.gmra.mrb[90].mxu1 %v930_v19 }
 0x124   : > { %3001 = vmatprep.mubr.msk.f32.mxu0 %vm3780_vm0, %v3781_v6  ;;  %3249 = vmatprep.mubr.msk.f32.mxu1 %vm3780_vm0, %v3781_v6 }
 0x125   : > { %v931_v24 = vmax.f32 %v674_v35, 0.0 }
 0x126   : > { %v678_v50 = vpop.f32.mrb[30].mxu0 }
 0x127   : > { %v679_v23 = vadd.f32 %v4476_v20, %v678_v50  ;;  %v2836_v53 = vpop.f32.mrb[31].mxu0  ;;  %3002 = vmatmul.mubr.msk.f32.gmra.mrb[136].mxu0 %vm347_vm1, %v3977_v34  ;;  %3250 = vmatmul.mubr.f32.gmra.mrb[92].mxu1 %v931_v24 }
 0x128   : > { %3004 = vmatprep.mubr.msk.f32.mxu0 %vm3780_vm0, %v3781_v6  ;;  %3252 = vmatprep.mubr.msk.f32.mxu1 %vm3780_vm0, %v3781_v6 }
 0x129   : > { %v932_v29 = vmax.f32 %v679_v23, 0.0 }
 0x12a   : > { %v683_v28 = vpop.f32.mrb[32].mxu0 }
 0x12b   : > { %v684_v33 = vadd.f32 %v4476_v20, %v683_v28  ;;  %v2839_v36 = vpop.f32.mrb[33].mxu0  ;;  %3005 = vmatmul.mubr.msk.f32.gmra.mrb[138].mxu0 %vm347_vm1, %v3992_v37  ;;  %3253 = vmatmul.mubr.f32.gmra.mrb[94].mxu1 %v932_v29 }
 0x12c   : > { %3007 = vmatprep.mubr.msk.f32.mxu0 %vm3780_vm0, %v3781_v6  ;;  %3255 = vmatprep.mubr.msk.f32.mxu1 %vm3780_vm0, %v3781_v6 }
 0x12d   : > { %v933_v34 = vmax.f32 %v684_v33, 0.0 }
 0x12e   : > { %v688_v62 = vpop.f32.mrb[34].mxu0 }
 0x12f   : > { %v689_v38 = vadd.f32 %v4476_v20, %v688_v62  ;;  %v2842_v43 = vpop.f32.mrb[35].mxu0  ;;  %3008 = vmatmul.mubr.msk.f32.gmra.mrb[140].mxu0 %vm347_vm1, %v4013_v41  ;;  %3256 = vmatmul.mubr.f32.gmra.mrb[96].mxu1 %v933_v34 }
 0x130   : > { %3010 = vmatprep.mubr.msk.f32.mxu0 %vm3780_vm0, %v3781_v6  ;;  %3258 = vmatprep.mubr.msk.f32.mxu1 %vm3780_vm0, %v3781_v6 }
 0x131   : > { %v934_v37 = vmax.f32 %v689_v38, 0.0 }
 0x132   : > { %v693_v45 = vpop.f32.mrb[36].mxu0 }
 0x133   : > { %v694_v9 = vadd.f32 %v4476_v20, %v693_v45  ;;  %v2845_v47 = vpop.f32.mrb[37].mxu0  ;;  %3011 = vmatmul.mubr.msk.f32.gmra.mrb[142].mxu0 %vm347_vm1, %v4027_v44  ;;  %3259 = vmatmul.mubr.f32.gmra.mrb[98].mxu1 %v934_v37 }
 0x134   : > { %3013 = vmatprep.mubr.msk.f32.mxu0 %vm3780_vm0, %v3781_v6  ;;  %3261 = vmatprep.mubr.msk.f32.mxu1 %vm3780_vm0, %v3781_v6 }
 0x135   : > { %v935_v41 = vmax.f32 %v694_v9, 0.0 }
 0x136   : > { %v698_v49 = vpop.f32.mrb[38].mxu0 }
 0x137   : > { %v699_v54 = vadd.f32 %v4476_v20, %v698_v49  ;;  %v2848_v10 = vpop.f32.mrb[39].mxu0  ;;  %3014 = vmatmul.mubr.msk.f32.gmra.mrb[144].mxu0 %vm347_vm1, %v4042_v46  ;;  %3262 = vmatmul.mubr.f32.gmra.mrb[100].mxu1 %v935_v41 }
 0x138   : > { %3016 = vmatprep.mubr.msk.f32.mxu0 %vm3780_vm0, %v3781_v6  ;;  %3264 = vmatprep.mubr.msk.f32.mxu1 %vm3780_vm0, %v3781_v6 }
 0x139   : > { %v936_v44 = vmax.f32 %v699_v54, 0.0 }
 0x13a   : > { %v703_v56 = vpop.f32.mrb[40].mxu0 }
 0x13b   : > { %v704_v58 = vadd.f32 %v4476_v20, %v703_v56  ;;  %v2851_v60 = vpop.f32.mrb[41].mxu0  ;;  %3017 = vmatmul.mubr.msk.f32.gmra.mrb[146].mxu0 %vm347_vm1, %v4056_v48  ;;  %3265 = vmatmul.mubr.f32.gmra.mrb[102].mxu1 %v936_v44 }
 0x13c   : > { %3019 = vmatprep.mubr.msk.f32.mxu0 %vm3780_vm0, %v3781_v6  ;;  %3267 = vmatprep.mubr.msk.f32.mxu1 %vm3780_vm0, %v3781_v6 }
 0x13d   : > { %v937_v46 = vmax.f32 %v704_v58, 0.0 }
 0x13e   : > { %v708_v12 = vpop.f32.mrb[42].mxu0 }
 0x13f   : > { %v709_v1 = vadd.f32 %v4476_v20, %v708_v12  ;;  %v2854_v4 = vpop.f32.mrb[43].mxu0  ;;  %3020 = vmatmul.mubr.msk.f32.gmra.mrb[148].mxu0 %vm347_vm1, %v4076_v52  ;;  %3268 = vmatmul.mubr.f32.gmra.mrb[104].mxu1 %v937_v46 }
 0x140   : > { %3022 = vmatprep.mubr.msk.f32.mxu0 %vm3780_vm0, %v3781_v6  ;;  %3270 = vmatprep.mubr.msk.f32.mxu1 %vm3780_vm0, %v3781_v6 }
 0x141   : > { %v938_v48 = vmax.f32 %v709_v1, 0.0 }
 0x142   : > { %v713_v3 = vpop.f32.mrb[44].mxu0 }
 0x143   : > { %v714_v14 = vadd.f32 %v4476_v20, %v713_v3  ;;  %v2857_v8 = vpop.f32.mrb[45].mxu0  ;;  %3023 = vmatmul.mubr.msk.f32.gmra.mrb[150].mxu0 %vm347_vm1, %v4090_v55  ;;  %3271 = vmatmul.mubr.f32.gmra.mrb[106].mxu1 %v938_v48 }
 0x144   : > { %3025 = vmatprep.mubr.msk.f32.mxu0 %vm3780_vm0, %v3781_v6  ;;  %3273 = vmatprep.mubr.msk.f32.mxu1 %vm3780_vm0, %v3781_v6 }
 0x145   : > { %v939_v52 = vmax.f32 %v714_v14, 0.0 }
 0x146   : > { %v718_v13 = vpop.f32.mrb[46].mxu0 }
 0x147   : > { %v719_v17 = vadd.f32 %v4476_v20, %v718_v13  ;;  %v2860_v15 = vpop.f32.mrb[47].mxu0  ;;  %3026 = vmatmul.mubr.msk.f32.gmra.mrb[152].mxu0 %vm347_vm1, %v4105_v57  ;;  %3274 = vmatmul.mubr.f32.gmra.mrb[108].mxu1 %v939_v52 }
 0x148   : > { %3028 = vmatprep.mubr.msk.f32.mxu0 %vm3780_vm0, %v3781_v6  ;;  %3276 = vmatprep.mubr.msk.f32.mxu1 %vm3780_vm0, %v3781_v6 }
 0x149   : > { %v940_v55 = vmax.f32 %v719_v17, 0.0 }
 0x14a   : > { %v723_v21 = vpop.f32.mrb[48].mxu0 }
 0x14b   : > { %v724_v25 = vadd.f32 %v4476_v20, %v723_v21  ;;  %v2863_v27 = vpop.f32.mrb[49].mxu0  ;;  %3029 = vmatmul.mubr.msk.f32.gmra.mrb[154].mxu0 %vm347_vm1, %v4119_v59  ;;  %3277 = vmatmul.mubr.f32.gmra.mrb[110].mxu1 %v940_v55 }
 0x14c   : > { %3031 = vmatprep.mubr.msk.f32.mxu0 %vm3780_vm0, %v3781_v6  ;;  %3279 = vmatprep.mubr.msk.f32.mxu1 %vm3780_vm0, %v3781_v6 }
 0x14d   : > { %v941_v57 = vmax.f32 %v724_v25, 0.0 }
 0x14e   : > { %v728_v19 = vpop.f32.mrb[50].mxu0 }
 0x14f   : > { %v729_v31 = vadd.f32 %v4476_v20, %v728_v19  ;;  %v2866_v35 = vpop.f32.mrb[51].mxu0  ;;  %3032 = vmatmul.mubr.msk.f32.gmra.mrb[156].mxu0 %vm347_vm1, %v4139_v63  ;;  %3280 = vmatmul.mubr.f32.gmra.mrb[112].mxu1 %v941_v57 }
 0x150   : > { %3034 = vmatprep.mubr.msk.f32.mxu0 %vm3780_vm0, %v3781_v6  ;;  %3282 = vmatprep.mubr.msk.f32.mxu1 %vm3780_vm0, %v3781_v6 }
 0x151   : > { %v942_v59 = vmax.f32 %v729_v31, 0.0 }
 0x152   : > { %v733_v40 = vpop.f32.mrb[52].mxu0 }
 0x153   : > { %v734_v24 = vadd.f32 %v4476_v20, %v733_v40  ;;  %v2869_v50 = vpop.f32.mrb[53].mxu0  ;;  %3035 = vmatmul.mubr.msk.f32.gmra.mrb[158].mxu0 %vm347_vm1, %v4153_v2  ;;  %3283 = vmatmul.mubr.f32.gmra.mrb[114].mxu1 %v942_v59 }
 0x154   : > { %3037 = vmatprep.mubr.msk.f32.mxu0 %vm3780_vm0, %v3781_v6  ;;  %3285 = vmatprep.mubr.msk.f32.mxu1 %vm3780_vm0, %v3781_v6 }
 0x155   : > { %v943_v63 = vmax.f32 %v734_v24, 0.0 }
 0x156   : > { %v738_v23 = vpop.f32.mrb[54].mxu0 }
 0x157   : > { %v739_v53 = vadd.f32 %v4476_v20, %v738_v23  ;;  %v2872_v29 = vpop.f32.mrb[55].mxu0  ;;  %3038 = vmatmul.mubr.msk.f32.gmra.mrb[160].mxu0 %vm347_vm1, %v4168_v5  ;;  %3286 = vmatmul.mubr.f32.gmra.mrb[116].mxu1 %v943_v63 }
 0x158   : > { %3040 = vmatprep.mubr.msk.f32.mxu0 %vm3780_vm0, %v3781_v6  ;;  %3288 = vmatprep.mubr.msk.f32.mxu1 %vm3780_vm0, %v3781_v6 }
 0x159   : > { %v944_v2 = vmax.f32 %v739_v53, 0.0 }
 0x15a   : > { %v743_v28 = vpop.f32.mrb[56].mxu0 }
 0x15b   : > { %v744_v33 = vadd.f32 %v4476_v20, %v743_v28  ;;  %v2875_v36 = vpop.f32.mrb[57].mxu0  ;;  %3041 = vmatmul.mubr.msk.f32.gmra.mrb[162].mxu0 %vm347_vm1, %v4182_v7  ;;  %3289 = vmatmul.mubr.f32.gmra.mrb[118].mxu1 %v944_v2 }
 0x15c   : > { %3043 = vmatprep.mubr.msk.f32.mxu0 %vm3780_vm0, %v3781_v6  ;;  %3291 = vmatprep.mubr.msk.f32.mxu1 %vm3780_vm0, %v3781_v6 }
 0x15d   : > { %v945_v5 = vmax.f32 %v744_v33, 0.0 }
 0x15e   : > { %v748_v34 = vpop.f32.mrb[58].mxu0 }
 0x15f   : > { %v749_v62 = vadd.f32 %v4476_v20, %v748_v34  ;;  %v2878_v38 = vpop.f32.mrb[59].mxu0  ;;  %3044 = vmatmul.mubr.msk.f32.gmra.mrb[164].mxu0 %vm347_vm1, %v4202_v11  ;;  %3292 = vmatmul.mubr.f32.gmra.mrb[120].mxu1 %v945_v5 }
 0x160   : > { %3046 = vmatprep.mubr.msk.f32.mxu0 %vm3780_vm0, %v3781_v6  ;;  %3294 = vmatprep.mubr.msk.f32.mxu1 %vm3780_vm0, %v3781_v6 }
 0x161   : > { %v946_v7 = vmax.f32 %v749_v62, 0.0 }
 0x162   : > { %v753_v43 = vpop.f32.mrb[60].mxu0 }
 0x163   : > { %v754_v37 = vadd.f32 %v4476_v20, %v753_v43  ;;  %v2881_v45 = vpop.f32.mrb[61].mxu0  ;;  %3047 = vmatmul.mubr.msk.f32.gmra.mrb[166].mxu0 %vm347_vm1, %v4216_v16  ;;  %3295 = vmatmul.mubr.f32.gmra.mrb[122].mxu1 %v946_v7 }
 0x164   : > { %3049 = vmatprep.mubr.msk.f32.mxu0 %vm3780_vm0, %v3781_v6  ;;  %3297 = vmatprep.mubr.msk.f32.mxu1 %vm3780_vm0, %v3781_v6 }
 0x165   : > { %v947_v11 = vmax.f32 %v754_v37, 0.0 }
 0x166   : > { %v758_v9 = vpop.f32.mrb[62].mxu0 }
 0x167   : > { %v759_v47 = vadd.f32 %v4476_v20, %v758_v9  ;;  %v2884_v41 = vpop.f32.mrb[63].mxu0  ;;  %3050 = vmatmul.mubr.msk.f32.gmra.mrb[168].mxu0 %vm347_vm1, %v4230_v18  ;;  %3298 = vmatmul.mubr.f32.gmra.mrb[124].mxu1 %v947_v11 }
 0x168   : > { %3052 = vmatprep.mubr.msk.f32.mxu0 %vm3780_vm0, %v3781_v6  ;;  %3300 = vmatprep.mubr.msk.f32.mxu1 %vm3780_vm0, %v3781_v6 }
 0x169   : > { %v948_v16 = vmax.f32 %v759_v47, 0.0 }
 0x16a   : > { %v763_v49 = vpop.f32.mrb[64].mxu0 }
 0x16b   : > { %v764_v54 = vadd.f32 %v4476_v20, %v763_v49  ;;  %v2887_v10 = vpop.f32.mrb[65].mxu0  ;;  %3053 = vmatmul.mubr.msk.f32.gmra.mrb[170].mxu0 %vm347_vm1, %v4244_v22  ;;  %3301 = vmatmul.mubr.f32.gmra.mrb[0].mxu1 %v948_v16 }
 0x16c   : > { %3055 = vmatprep.mubr.msk.f32.mxu0 %vm3780_vm0, %v3781_v6  ;;  %3303 = vmatprep.mubr.msk.f32.mxu1 %vm3780_vm0, %v3781_v6 }
 0x16d   : > { %v949_v18 = vmax.f32 %v764_v54, 0.0 }
 0x16e   : > { %v768_v44 = vpop.f32.mrb[66].mxu0 }
 0x16f   : > { %v769_v56 = vadd.f32 %v4476_v20, %v768_v44  ;;  %v2890_v58 = vpop.f32.mrb[67].mxu0  ;;  %3056 = vmatmul.mubr.msk.f32.gmra.mrb[172].mxu0 %vm347_vm1, %v4258_v26  ;;  %3304 = vmatmul.mubr.f32.gmra.mrb[2].mxu1 %v949_v18 }
 0x170   : > { %3058 = vmatprep.mubr.msk.f32.mxu0 %vm3780_vm0, %v3781_v6  ;;  %3306 = vmatprep.mubr.msk.f32.mxu1 %vm3780_vm0, %v3781_v6 }
 0x171   : > { %v950_v22 = vmax.f32 %v769_v56, 0.0 }
 0x172   : > { %v773_v60 = vpop.f32.mrb[68].mxu0 }
 0x173   : > { %v774_v46 = vadd.f32 %v4476_v20, %v773_v60  ;;  %v2893_v12 = vpop.f32.mrb[69].mxu0  ;;  %3059 = vmatmul.mubr.msk.f32.gmra.mrb[174].mxu0 %vm347_vm1, %v4272_v30  ;;  %3307 = vmatmul.mubr.f32.gmra.mrb[4].mxu1 %v950_v22 }
 0x174   : > { %3061 = vmatprep.mubr.msk.f32.mxu0 %vm3780_vm0, %v3781_v6  ;;  %3309 = vmatprep.mubr.msk.f32.mxu1 %vm3780_vm0, %v3781_v6 }
 0x175   : > { %v951_v26 = vmax.f32 %v774_v46, 0.0 }
 0x176   : > { %v778_v1 = vpop.f32.mrb[70].mxu0 }
 0x177   : > { %v779_v4 = vadd.f32 %v4476_v20, %v778_v1  ;;  %v2896_v48 = vpop.f32.mrb[71].mxu0  ;;  %3062 = vmatmul.mubr.msk.f32.gmra.mrb[176].mxu0 %vm347_vm1, %v4286_v32  ;;  %3310 = vmatmul.mubr.f32.gmra.mrb[6].mxu1 %v951_v26 }
 0x178   : > { %3064 = vmatprep.mubr.msk.f32.mxu0 %vm3780_vm0, %v3781_v6  ;;  %3312 = vmatprep.mubr.msk.f32.mxu1 %vm3780_vm0, %v3781_v6 }
 0x179   : > { %v952_v30 = vmax.f32 %v779_v4, 0.0 }
 0x17a   : > { %v783_v3 = vpop.f32.mrb[72].mxu0 }
 0x17b   : > { %v784_v14 = vadd.f32 %v4476_v20, %v783_v3  ;;  %v2899_v8 = vpop.f32.mrb[73].mxu0  ;;  %3065 = vmatmul.mubr.msk.f32.gmra.mrb[178].mxu0 %vm347_vm1, %v4300_v39  ;;  %3313 = vmatmul.mubr.f32.gmra.mrb[8].mxu1 %v952_v30 }
 0x17c   : > { %3067 = vmatprep.mubr.msk.f32.mxu0 %vm3780_vm0, %v3781_v6  ;;  %3315 = vmatprep.mubr.msk.f32.mxu1 %vm3780_vm0, %v3781_v6 }
 0x17d   : > { %v953_v32 = vmax.f32 %v784_v14, 0.0 }
 0x17e   : > { %v788_v52 = vpop.f32.mrb[74].mxu0 }
 0x17f   : > { %v789_v13 = vadd.f32 %v4476_v20, %v788_v52  ;;  %v2902_v17 = vpop.f32.mrb[75].mxu0  ;;  %3068 = vmatmul.mubr.msk.f32.gmra.mrb[180].mxu0 %vm347_vm1, %v4314_v42  ;;  %3316 = vmatmul.mubr.f32.gmra.mrb[10].mxu1 %v953_v32 }
 0x180   : > { %3070 = vmatprep.mubr.msk.f32.mxu0 %vm3780_vm0, %v3781_v6  ;;  %3318 = vmatprep.mubr.msk.f32.mxu1 %vm3780_vm0, %v3781_v6 }
 0x181   : > { %v954_v39 = vmax.f32 %v789_v13, 0.0 }
 0x182   : > { %v793_v15 = vpop.f32.mrb[76].mxu0 }
 0x183   : > { %v794_v55 = vadd.f32 %v4476_v20, %v793_v15  ;;  %v2905_v21 = vpop.f32.mrb[77].mxu0  ;;  %3071 = vmatmul.mubr.msk.f32.gmra.mrb[182].mxu0 %vm347_vm1, %v4328_v51  ;;  %3319 = vmatmul.mubr.f32.gmra.mrb[12].mxu1 %v954_v39 }
 0x184   : > { %3073 = vmatprep.mubr.msk.f32.mxu0 %vm3780_vm0, %v3781_v6  ;;  %3321 = vmatprep.mubr.msk.f32.mxu1 %vm3780_vm0, %v3781_v6 }
 0x185   : > { %v955_v42 = vmax.f32 %v794_v55, 0.0 }
 0x186   : > { %v798_v25 = vpop.f32.mrb[78].mxu0 }
 0x187   : > { %v799_v27 = vadd.f32 %v4476_v20, %v798_v25  ;;  %v2908_v57 = vpop.f32.mrb[79].mxu0  ;;  %3074 = vmatmul.mubr.msk.f32.gmra.mrb[184].mxu0 %vm347_vm1, %v4342_v61  ;;  %3322 = vmatmul.mubr.f32.gmra.mrb[14].mxu1 %v955_v42 }
 0x188   : > { %3076 = vmatprep.mubr.msk.f32.mxu0 %vm3780_vm0, %v3781_v6  ;;  %3324 = vmatprep.mubr.msk.f32.mxu1 %vm3780_vm0, %v3781_v6 }
 0x189   : > { %v956_v51 = vmax.f32 %v799_v27, 0.0 }
 0x18a   : > { %v803_v19 = vpop.f32.mrb[80].mxu0 }
 0x18b   : > { %v804_v31 = vadd.f32 %v4476_v20, %v803_v19  ;;  %v2911_v35 = vpop.f32.mrb[81].mxu0  ;;  %3077 = vmatmul.mubr.msk.f32.gmra.mrb[186].mxu0 %vm347_vm1, %v4356_v0  ;;  %3325 = vmatmul.mubr.f32.gmra.mrb[16].mxu1 %v956_v51 }
 0x18c   : > { %3327 = vmatprep.mubr.msk.f32.mxu1 %vm3780_vm0, %v3781_v6 }
 0x18d   : > { %v957_v61 = vmax.f32 %v804_v31, 0.0 }
 0x18e   : > { %v808_v59 = vpop.f32.mrb[82].mxu0 }
 0x18f   : > { %v809_v40 = vadd.f32 %v4476_v20, %v808_v59  ;;  %v2914_v24 = vpop.f32.mrb[83].mxu0  ;;  %3328 = vmatmul.mubr.f32.gmra.mrb[18].mxu1 %v957_v61 }
 0x190   : > { %3330 = vmatprep.mubr.msk.f32.mxu1 %vm3780_vm0, %v3781_v6 }
 0x191   : > { %v958_v50 = vmax.f32 %v809_v40, 0.0 }
 0x192   : > { %v813_v63 = vpop.f32.mrb[84].mxu0 }
 0x193   : > { %v814_v23 = vadd.f32 %v4476_v20, %v813_v63  ;;  %v2917_v53 = vpop.f32.mrb[85].mxu0  ;;  %3331 = vmatmul.mubr.f32.gmra.mrb[20].mxu1 %v958_v50 }
 0x194   : > { %3333 = vmatprep.mubr.msk.f32.mxu1 %vm3780_vm0, %v3781_v6 }
 0x195   : > { %v959_v0 = vmax.f32 %v814_v23, 0.0 }
 0x196   : > { %v818_v29 = vpop.f32.mrb[86].mxu0 }
 0x197   : > { %v819_v2 = vadd.f32 %v4476_v20, %v818_v29  ;;  %v2920_v28 = vpop.f32.mrb[87].mxu0  ;;  %3334 = vmatmul.mubr.f32.gmra.mrb[22].mxu1 %v959_v0 }
 0x198   : > { %3336 = vmatprep.mubr.msk.f32.mxu1 %vm3780_vm0, %v3781_v6 }
 0x199   : > { %v960_v33 = vmax.f32 %v819_v2, 0.0 }
 0x19a   : > { %v823_v36 = vpop.f32.mrb[88].mxu0 }
 0x19b   : > { %v824_v5 = vadd.f32 %v4476_v20, %v823_v36  ;;  %v2923_v34 = vpop.f32.mrb[89].mxu0  ;;  %3337 = vmatmul.mubr.f32.gmra.mrb[24].mxu1 %v960_v33 }
 0x19c   : > { %3339 = vmatprep.mubr.msk.f32.mxu1 %vm3780_vm0, %v3781_v6 }
 0x19d   : > { %v961_v62 = vmax.f32 %v824_v5, 0.0 }
 0x19e   : > { %v828_v38 = vpop.f32.mrb[90].mxu0 }
 0x19f   : > { %v829_v7 = vadd.f32 %v4476_v20, %v828_v38  ;;  %v2926_v43 = vpop.f32.mrb[91].mxu0  ;;  %3340 = vmatmul.mubr.f32.gmra.mrb[26].mxu1 %v961_v62 }
 0x1a0   : > { %3342 = vmatprep.mubr.msk.f32.mxu1 %vm3780_vm0, %v3781_v6 }
 0x1a1   : > { %v962_v37 = vmax.f32 %v829_v7, 0.0 }
 0x1a2   : > { %v833_v45 = vpop.f32.mrb[92].mxu0 }
 0x1a3   : > { %v834_v11 = vadd.f32 %v4476_v20, %v833_v45  ;;  %v2929_v9 = vpop.f32.mrb[93].mxu0  ;;  %3343 = vmatmul.mubr.f32.gmra.mrb[28].mxu1 %v962_v37 }
 0x1a4   : > { %3345 = vmatprep.mubr.msk.f32.mxu1 %vm3780_vm0, %v3781_v6 }
 0x1a5   : > { %v963_v47 = vmax.f32 %v834_v11, 0.0 }
 0x1a6   : > { %v838_v41 = vpop.f32.mrb[94].mxu0 }
 0x1a7   : > { %v839_v16 = vadd.f32 %v4476_v20, %v838_v41  ;;  %v2932_v49 = vpop.f32.mrb[95].mxu0  ;;  %3346 = vmatmul.mubr.f32.gmra.mrb[30].mxu1 %v963_v47 }
 0x1a8   : > { %3348 = vmatprep.mubr.msk.f32.mxu1 %vm3780_vm0, %v3781_v6 }
 0x1a9   : > { %v964_v54 = vmax.f32 %v839_v16, 0.0 }
 0x1aa   : > { %v843_v10 = vpop.f32.mrb[96].mxu0 }
 0x1ab   : > { %v844_v18 = vadd.f32 %v4476_v20, %v843_v10  ;;  %v2935_v44 = vpop.f32.mrb[97].mxu0  ;;  %3349 = vmatmul.mubr.f32.gmra.mrb[32].mxu1 %v964_v54 }
 0x1ac   : > { %3351 = vmatprep.mubr.msk.f32.mxu1 %vm3780_vm0, %v3781_v6 }
 0x1ad   : > { %v965_v56 = vmax.f32 %v844_v18, 0.0 }
 0x1ae   : > { %v848_v58 = vpop.f32.mrb[98].mxu0 }
 0x1af   : > { %v849_v22 = vadd.f32 %v4476_v20, %v848_v58  ;;  %v2938_v60 = vpop.f32.mrb[99].mxu0  ;;  %3352 = vmatmul.mubr.f32.gmra.mrb[34].mxu1 %v965_v56 }
 0x1b0   : > { %3354 = vmatprep.mubr.msk.f32.mxu1 %vm3780_vm0, %v3781_v6 }
 0x1b1   : > { %v966_v46 = vmax.f32 %v849_v22, 0.0 }
 0x1b2   : > { %v853_v12 = vpop.f32.mrb[100].mxu0 }
 0x1b3   : > { %v854_v26 = vadd.f32 %v4476_v20, %v853_v12  ;;  %v2941_v1 = vpop.f32.mrb[101].mxu0  ;;  %3355 = vmatmul.mubr.f32.gmra.mrb[36].mxu1 %v966_v46 }
 0x1b4   : > { %3357 = vmatprep.mubr.msk.f32.mxu1 %vm3780_vm0, %v3781_v6 }
 0x1b5   : > { %v967_v4 = vmax.f32 %v854_v26, 0.0 }
 0x1b6   : > { %v858_v48 = vpop.f32.mrb[102].mxu0 }
 0x1b7   : > { %v859_v30 = vadd.f32 %v4476_v20, %v858_v48  ;;  %v2944_v3 = vpop.f32.mrb[103].mxu0  ;;  %3358 = vmatmul.mubr.f32.gmra.mrb[38].mxu1 %v967_v4 }
 0x1b8   : > { %3360 = vmatprep.mubr.msk.f32.mxu1 %vm3780_vm0, %v3781_v6 }
 0x1b9   : > { %v968_v14 = vmax.f32 %v859_v30, 0.0 }
 0x1ba   : > { %v863_v8 = vpop.f32.mrb[104].mxu0 }
 0x1bb   : > { %v864_v32 = vadd.f32 %v4476_v20, %v863_v8  ;;  %v2947_v52 = vpop.f32.mrb[105].mxu0  ;;  %3361 = vmatmul.mubr.f32.gmra.mrb[40].mxu1 %v968_v14  ;;  %v4849_v14 = vld [vmem:[%s5323_s5] ss:$0 sm:$0xff] }
 0x1bc   : > { %3363 = vmatprep.mubr.msk.f32.mxu1 %vm3780_vm0, %v3781_v6 }
 0x1bd   : > { %v969_v13 = vmax.f32 %v864_v32, 0.0 }
 0x1be   : > { %v868_v17 = vpop.f32.mrb[106].mxu0 }
 0x1bf   : > { %v869_v39 = vadd.f32 %v4476_v20, %v868_v17  ;;  %v2950_v15 = vpop.f32.mrb[107].mxu0  ;;  %3364 = vmatmul.mubr.f32.gmra.mrb[42].mxu1 %v969_v13 }
 0x1c0   : > { %3366 = vmatprep.mubr.msk.f32.mxu1 %vm3780_vm0, %v3781_v6 }
 0x1c1   : > { %v970_v55 = vmax.f32 %v869_v39, 0.0 }
 0x1c2   : > { %v873_v21 = vpop.f32.mrb[108].mxu0  ;;  %v4802_v42 = vpop.f32.mrb[64].mxu1 }
 0x1c3   : > { %v874_v25 = vadd.f32 %v4476_v20, %v873_v21  ;;  %v2953_v27 = vpop.f32.mrb[109].mxu0  ;;  %v3209_v57 = vpop.f32.mrb[65].mxu1  ;;  %3367 = vmatmul.mubr.f32.gmra.mrb[44].mxu1 %v970_v55 }
 0x1c4   : > { %3369 = vmatprep.mubr.msk.f32.mxu1 %vm3780_vm0, %v3781_v6 }
 0x1c5   : > { %v971_v51 = vmax.f32 %v874_v25, 0.0 }
 0x1c6   : > { %v878_v19 = vpop.f32.mrb[110].mxu0  ;;  %v4807_v31 = vpop.f32.mrb[66].mxu1 }
 0x1c7   : > { %v879_v35 = vadd.f32 %v4476_v20, %v878_v19  ;;  %v2956_v61 = vpop.f32.mrb[111].mxu0  ;;  %v3212_v59 = vpop.f32.mrb[67].mxu1  ;;  %3370 = vmatmul.mubr.f32.gmra.mrb[46].mxu1 %v971_v51 }
 0x1c8   : > { %3372 = vmatprep.mubr.msk.f32.mxu1 %vm3780_vm0, %v3781_v6 }
 0x1c9   : > { %v972_v40 = vmax.f32 %v879_v35, 0.0 }
 0x1ca   : > { %v883_v24 = vpop.f32.mrb[112].mxu0  ;;  %v4812_v50 = vpop.f32.mrb[68].mxu1 }
 0x1cb   : > { %v884_v63 = vadd.f32 %v4476_v20, %v883_v24  ;;  %v2959_v23 = vpop.f32.mrb[113].mxu0  ;;  %v3215_v53 = vpop.f32.mrb[69].mxu1  ;;  %3373 = vmatmul.mubr.f32.gmra.mrb[48].mxu1 %v972_v40 }
 0x1cc   : > { %3375 = vmatprep.mubr.msk.f32.mxu1 %vm3780_vm0, %v3781_v6 }
 0x1cd   : > { %v973_v0 = vmax.f32 %v884_v63, 0.0 }
 0x1ce   : > { %v888_v29 = vpop.f32.mrb[114].mxu0  ;;  %v4817_v2 = vpop.f32.mrb[70].mxu1 }
 0x1cf   : > { %v889_v28 = vadd.f32 %v4476_v20, %v888_v29  ;;  %v2962_v33 = vpop.f32.mrb[115].mxu0  ;;  %v3218_v36 = vpop.f32.mrb[71].mxu1  ;;  %3376 = vmatmul.mubr.f32.gmra.mrb[50].mxu1 %v973_v0 }
 0x1d0   : > { %3378 = vmatprep.mubr.msk.f32.mxu1 %vm3780_vm0, %v3781_v6 }
 0x1d1   : > { %v974_v5 = vmax.f32 %v889_v28, 0.0 }
 0x1d2   : > { %v893_v34 = vpop.f32.mrb[116].mxu0  ;;  %v4822_v62 = vpop.f32.mrb[72].mxu1 }
 0x1d3   : > { %v894_v38 = vadd.f32 %v4476_v20, %v893_v34  ;;  %v2965_v7 = vpop.f32.mrb[117].mxu0  ;;  %v3221_v43 = vpop.f32.mrb[73].mxu1  ;;  %3379 = vmatmul.mubr.f32.gmra.mrb[52].mxu1 %v974_v5 }
 0x1d4   : > { %3381 = vmatprep.mubr.msk.f32.mxu1 %vm3780_vm0, %v3781_v6 }
 0x1d5   : > { %v975_v37 = vmax.f32 %v894_v38, 0.0 }
 0x1d6   : > { %v898_v45 = vpop.f32.mrb[118].mxu0  ;;  %v4827_v11 = vpop.f32.mrb[74].mxu1 }
 0x1d7   : > { %v899_v9 = vadd.f32 %v4476_v20, %v898_v45  ;;  %v2968_v47 = vpop.f32.mrb[119].mxu0  ;;  %v3224_v41 = vpop.f32.mrb[75].mxu1  ;;  %3382 = vmatmul.mubr.f32.gmra.mrb[54].mxu1 %v975_v37 }
 0x1d8   : > { %3384 = vmatprep.mubr.msk.f32.mxu1 %vm3780_vm0, %v3781_v6 }
 0x1d9   : > { %v976_v16 = vmax.f32 %v899_v9, 0.0 }
 0x1da   : > { %v903_v49 = vpop.f32.mrb[120].mxu0  ;;  %v4832_v54 = vpop.f32.mrb[76].mxu1 }
 0x1db   : > { %v904_v10 = vadd.f32 %v4476_v20, %v903_v49  ;;  %v2971_v18 = vpop.f32.mrb[121].mxu0  ;;  %v3227_v44 = vpop.f32.mrb[77].mxu1  ;;  %3385 = vmatmul.mubr.f32.gmra.mrb[56].mxu1 %v976_v16 }
 0x1dc   : > { %3387 = vmatprep.mubr.msk.f32.mxu1 %vm3780_vm0, %v3781_v6 }
 0x1dd   : > { %v977_v56 = vmax.f32 %v904_v10, 0.0 }
 0x1de   : > { %v908_v58 = vpop.f32.mrb[122].mxu0  ;;  %v4837_v22 = vpop.f32.mrb[78].mxu1 }
 0x1df   : > { %v909_v60 = vadd.f32 %v4476_v20, %v908_v58  ;;  %v2974_v46 = vpop.f32.mrb[123].mxu0  ;;  %v3230_v12 = vpop.f32.mrb[79].mxu1  ;;  %3388 = vmatmul.mubr.f32.gmra.mrb[58].mxu1 %v977_v56 }
 0x1e0   : > { %3390 = vmatprep.mubr.msk.f32.mxu1 %vm3780_vm0, %v3781_v6 }
 0x1e1   : > { %v978_v26 = vmax.f32 %v909_v60, 0.0 }
 0x1e2   : > { %v913_v1 = vpop.f32.mrb[124].mxu0  ;;  %v4842_v4 = vpop.f32.mrb[80].mxu1 }
 0x1e3   : > { %v914_v48 = vadd.f32 %v4476_v20, %v913_v1  ;;  %v2977_v30 = vpop.f32.mrb[125].mxu0  ;;  %v3233_v3 = vpop.f32.mrb[81].mxu1  ;;  %3391 = vmatmul.mubr.f32.gmra.mrb[60].mxu1 %v978_v26 }
 0x1e4   : > { %3393 = vmatprep.mubr.msk.f32.mxu1 %vm3780_vm0, %v3781_v6 }
 0x1e5   : > { %v979_v8 = vmax.f32 %v914_v48, 0.0 }
 0x1e6   : > { %v1057_v32 = vpop.f32.mrb[126].mxu0  ;;  %v4853_v52 = vpop.f32.mrb[82].mxu1 }
 0x1e7   : > { %v1058_v13 = vadd.f32 %v4849_v14, %v1057_v32  ;;  %v3236_v20 = vpop.f32.mrb[83].mxu1  ;;  %3394 = vmatmul.mubr.f32.gmra.mrb[62].mxu1 %v979_v8  ;;  %v2988_v17 = vpop.f32.mrb[127].mxu0 }
 0x1e9   : > { %v1767_v39 = vadd.f32 %v4802_v42, %v1058_v13 }
 0x1ea   : > { %v1062_v15 = vpop.f32.mrb[128].mxu0  ;;  %v4857_v55 = vpop.f32.mrb[84].mxu1 }
 0x1eb   : > { %v1830_v21 = vmax.f32 %v1767_v39, 0.0  ;;  %v1063_v25 = vadd.f32 %v4849_v14, %v1062_v15  ;;  %v3239_v6 = vpop.f32.mrb[85].mxu1  ;;  %v2991_v27 = vpop.f32.mrb[129].mxu0 }
 0x1ed   : > { %1894 = vst.msk [vmem:[%s4860_s21] sm:$0xff] %vm1893_vm2, %v1830_v21  ;;  %v1768_v57 = vadd.f32 %v4807_v31, %v1063_v25 }
 0x1ee   : > { %v1067_v51 = vpop.f32.mrb[130].mxu0  ;;  %v4865_v42 = vpop.f32.mrb[86].mxu1 }
 0x1ef   : > { %v1831_v19 = vmax.f32 %v1768_v57, 0.0  ;;  %v1068_v35 = vadd.f32 %v4849_v14, %v1067_v51  ;;  %v3242_v61 = vpop.f32.mrb[87].mxu1  ;;  %v2994_v59 = vpop.f32.mrb[131].mxu0 }
 0x1f1   : > { %1895 = vst.msk [vmem:[%s4860_s21 + $0x8] sm:$0xff] %vm1893_vm2, %v1831_v19  ;;  %v1769_v40 = vadd.f32 %v4812_v50, %v1068_v35 }
 0x1f2   : > { %v1072_v24 = vpop.f32.mrb[132].mxu0  ;;  %v4871_v63 = vpop.f32.mrb[88].mxu1 }
 0x1f3   : > { %v1832_v23 = vmax.f32 %v1769_v40, 0.0  ;;  %v1073_v53 = vadd.f32 %v4849_v14, %v1072_v24  ;;  %v3245_v31 = vpop.f32.mrb[89].mxu1  ;;  %v2997_v0 = vpop.f32.mrb[133].mxu0 }
 0x1f5   : > { %1896 = vst.msk [vmem:[%s4860_s21 + $0x10] sm:$0xff] %vm1893_vm2, %v1832_v23  ;;  %v1770_v29 = vadd.f32 %v4817_v2, %v1073_v53 }
 0x1f6   : > { %v1077_v28 = vpop.f32.mrb[134].mxu0  ;;  %v4877_v33 = vpop.f32.mrb[90].mxu1 }
 0x1f7   : > { %v1833_v36 = vmax.f32 %v1770_v29, 0.0  ;;  %v1078_v5 = vadd.f32 %v4849_v14, %v1077_v28  ;;  %v3248_v50 = vpop.f32.mrb[91].mxu1  ;;  %v3000_v34 = vpop.f32.mrb[135].mxu0 }
 0x1f9   : > { %1897 = vst.msk [vmem:[%s4860_s21 + $0x18] sm:$0xff] %vm1893_vm2, %v1833_v36  ;;  %v1771_v38 = vadd.f32 %v4822_v62, %v1078_v5 }
 0x1fa   : > { %v1082_v7 = vpop.f32.mrb[136].mxu0  ;;  %v4883_v43 = vpop.f32.mrb[92].mxu1 }
 0x1fb   : > { %v1834_v37 = vmax.f32 %v1771_v38, 0.0  ;;  %v1083_v45 = vadd.f32 %v4849_v14, %v1082_v7  ;;  %v3251_v2 = vpop.f32.mrb[93].mxu1  ;;  %v3003_v9 = vpop.f32.mrb[137].mxu0 }
 0x1fd   : > { %1898 = vst.msk [vmem:[%s4860_s21 + $0x20] sm:$0xff] %vm1893_vm2, %v1834_v37  ;;  %v1772_v47 = vadd.f32 %v4827_v11, %v1083_v45 }
 0x1fe   : > { %v1087_v41 = vpop.f32.mrb[138].mxu0  ;;  %v4889_v16 = vpop.f32.mrb[94].mxu1 }
 0x1ff   : > { %v1835_v49 = vmax.f32 %v1772_v47, 0.0  ;;  %v1088_v10 = vadd.f32 %v4849_v14, %v1087_v41  ;;  %v3254_v62 = vpop.f32.mrb[95].mxu1  ;;  %v3006_v18 = vpop.f32.mrb[139].mxu0 }
 0x201   : > { %1899 = vst.msk [vmem:[%s4860_s21 + $0x28] sm:$0xff] %vm1893_vm2, %v1835_v49  ;;  %v1773_v44 = vadd.f32 %v4832_v54, %v1088_v10 }
 0x202   : > { %v1092_v56 = vpop.f32.mrb[140].mxu0  ;;  %v4895_v58 = vpop.f32.mrb[96].mxu1 }
 0x203   : > { %v1836_v60 = vmax.f32 %v1773_v44, 0.0  ;;  %v1093_v46 = vadd.f32 %v4849_v14, %v1092_v56  ;;  %v3257_v11 = vpop.f32.mrb[97].mxu1  ;;  %v3009_v12 = vpop.f32.mrb[141].mxu0 }
 0x205   : > { %1900 = vst.msk [vmem:[%s4860_s21 + $0x30] sm:$0xff] %vm1893_vm2, %v1836_v60  ;;  %v1774_v26 = vadd.f32 %v4837_v22, %v1093_v46 }
 0x206   : > { %v1097_v1 = vpop.f32.mrb[142].mxu0  ;;  %v4901_v48 = vpop.f32.mrb[98].mxu1 }
 0x207   : > { %v1837_v30 = vmax.f32 %v1774_v26, 0.0  ;;  %v1098_v3 = vadd.f32 %v4849_v14, %v1097_v1  ;;  %v3260_v54 = vpop.f32.mrb[99].mxu1  ;;  %v3012_v8 = vpop.f32.mrb[143].mxu0 }
 0x209   : > { %1901 = vst.msk [vmem:[%s4860_s21 + $0x38] sm:$0xff] %vm1893_vm2, %v1837_v30  ;;  %v1775_v32 = vadd.f32 %v4842_v4, %v1098_v3 }
 0x20a   : > { %v1102_v13 = vpop.f32.mrb[144].mxu0  ;;  %v4907_v20 = vpop.f32.mrb[100].mxu1 }
 0x20b   : > { %v1838_v17 = vmax.f32 %v1775_v32, 0.0  ;;  %v1103_v39 = vadd.f32 %v4849_v14, %v1102_v13  ;;  %v3263_v22 = vpop.f32.mrb[101].mxu1  ;;  %v3015_v15 = vpop.f32.mrb[145].mxu0 }
 0x20d   : > { %1902 = vst.msk [vmem:[%s4860_s21 + $0x40] sm:$0xff] %vm1893_vm2, %v1838_v17  ;;  %v1776_v21 = vadd.f32 %v4853_v52, %v1103_v39 }
 0x20e   : > { %v1107_v25 = vpop.f32.mrb[146].mxu0  ;;  %v4913_v6 = vpop.f32.mrb[102].mxu1 }
 0x20f   : > { %v1839_v27 = vmax.f32 %v1776_v21, 0.0  ;;  %v1108_v57 = vadd.f32 %v4849_v14, %v1107_v25  ;;  %v3266_v4 = vpop.f32.mrb[103].mxu1  ;;  %v3018_v51 = vpop.f32.mrb[147].mxu0 }
 0x211   : > { %1903 = vst.msk [vmem:[%s4860_s21 + $0x48] sm:$0xff] %vm1893_vm2, %v1839_v27  ;;  %v1777_v19 = vadd.f32 %v4857_v55, %v1108_v57 }
 0x212   : > { %v1112_v35 = vpop.f32.mrb[148].mxu0  ;;  %v4919_v61 = vpop.f32.mrb[104].mxu1 }
 0x213   : > { %v1840_v59 = vmax.f32 %v1777_v19, 0.0  ;;  %v1113_v40 = vadd.f32 %v4849_v14, %v1112_v35  ;;  %v3269_v52 = vpop.f32.mrb[105].mxu1  ;;  %v3021_v24 = vpop.f32.mrb[149].mxu0 }
 0x215   : > { %1904 = vst.msk [vmem:[%s4860_s21 + $0x50] sm:$0xff] %vm1893_vm2, %v1840_v59  ;;  %v1778_v23 = vadd.f32 %v4865_v42, %v1113_v40 }
 0x216   : > { %v1117_v53 = vpop.f32.mrb[150].mxu0  ;;  %v4925_v31 = vpop.f32.mrb[106].mxu1 }
 0x217   : > { %v1841_v0 = vmax.f32 %v1778_v23, 0.0  ;;  %v1118_v29 = vadd.f32 %v4849_v14, %v1117_v53  ;;  %v3272_v55 = vpop.f32.mrb[107].mxu1  ;;  %v3024_v28 = vpop.f32.mrb[151].mxu0 }
 0x219   : > { %1905 = vst.msk [vmem:[%s4860_s21 + $0x58] sm:$0xff] %vm1893_vm2, %v1841_v0  ;;  %v1779_v36 = vadd.f32 %v4871_v63, %v1118_v29 }
 0x21a   : > { %v1122_v5 = vpop.f32.mrb[152].mxu0  ;;  %v4931_v50 = vpop.f32.mrb[108].mxu1 }
 0x21b   : > { %v1842_v34 = vmax.f32 %v1779_v36, 0.0  ;;  %v1123_v38 = vadd.f32 %v4849_v14, %v1122_v5  ;;  %v3275_v42 = vpop.f32.mrb[109].mxu1  ;;  %v3027_v7 = vpop.f32.mrb[153].mxu0 }
 0x21d   : > { %1906 = vst.msk [vmem:[%s4860_s21 + $0x60] sm:$0xff] %vm1893_vm2, %v1842_v34  ;;  %v1780_v37 = vadd.f32 %v4877_v33, %v1123_v38 }
 0x21e   : > { %v1127_v45 = vpop.f32.mrb[154].mxu0  ;;  %v4937_v2 = vpop.f32.mrb[110].mxu1 }
 0x21f   : > { %v1843_v9 = vmax.f32 %v1780_v37, 0.0  ;;  %v1128_v47 = vadd.f32 %v4849_v14, %v1127_v45  ;;  %v3278_v63 = vpop.f32.mrb[111].mxu1  ;;  %v3030_v41 = vpop.f32.mrb[155].mxu0 }
 0x221   : > { %1907 = vst.msk [vmem:[%s4860_s21 + $0x68] sm:$0xff] %vm1893_vm2, %v1843_v9  ;;  %v1781_v49 = vadd.f32 %v4883_v43, %v1128_v47 }
 0x222   : > { %v1132_v10 = vpop.f32.mrb[156].mxu0  ;;  %v4943_v62 = vpop.f32.mrb[112].mxu1 }
 0x223   : > { %v1844_v18 = vmax.f32 %v1781_v49, 0.0  ;;  %v1133_v44 = vadd.f32 %v4849_v14, %v1132_v10  ;;  %v3281_v33 = vpop.f32.mrb[113].mxu1  ;;  %v3033_v56 = vpop.f32.mrb[157].mxu0 }
 0x225   : > { %1908 = vst.msk [vmem:[%s4860_s21 + $0x70] sm:$0xff] %vm1893_vm2, %v1844_v18  ;;  %v1782_v60 = vadd.f32 %v4889_v16, %v1133_v44 }
 0x226   : > { %v1137_v46 = vpop.f32.mrb[158].mxu0  ;;  %v4949_v11 = vpop.f32.mrb[114].mxu1 }
 0x227   : > { %v1845_v12 = vmax.f32 %v1782_v60, 0.0  ;;  %v1138_v26 = vadd.f32 %v4849_v14, %v1137_v46  ;;  %v3284_v43 = vpop.f32.mrb[115].mxu1  ;;  %v3036_v1 = vpop.f32.mrb[159].mxu0 }
 0x229   : > { %1909 = vst.msk [vmem:[%s4860_s21 + $0x78] sm:$0xff] %vm1893_vm2, %v1845_v12  ;;  %v1783_v30 = vadd.f32 %v4895_v58, %v1138_v26 }
 0x22a   : > { %v1142_v3 = vpop.f32.mrb[160].mxu0  ;;  %v4955_v54 = vpop.f32.mrb[116].mxu1 }
 0x22b   : > { %v1846_v8 = vmax.f32 %v1783_v30, 0.0  ;;  %v1143_v32 = vadd.f32 %v4849_v14, %v1142_v3  ;;  %v3287_v16 = vpop.f32.mrb[117].mxu1  ;;  %v3039_v13 = vpop.f32.mrb[161].mxu0 }
 0x22d   : > { %1910 = vst.msk [vmem:[%s4860_s21 + $0x80] sm:$0xff] %vm1893_vm2, %v1846_v8  ;;  %v1784_v17 = vadd.f32 %v4901_v48, %v1143_v32 }
 0x22e   : > { %v1147_v39 = vpop.f32.mrb[162].mxu0  ;;  %v4961_v22 = vpop.f32.mrb[118].mxu1 }
 0x22f   : > { %v1847_v15 = vmax.f32 %v1784_v17, 0.0  ;;  %v1148_v21 = vadd.f32 %v4849_v14, %v1147_v39  ;;  %v3290_v58 = vpop.f32.mrb[119].mxu1  ;;  %v3042_v25 = vpop.f32.mrb[163].mxu0 }
 0x231   : > { %1911 = vst.msk [vmem:[%s4860_s21 + $0x88] sm:$0xff] %vm1893_vm2, %v1847_v15  ;;  %v1785_v27 = vadd.f32 %v4907_v20, %v1148_v21 }
 0x232   : > { %v1152_v57 = vpop.f32.mrb[164].mxu0  ;;  %v4967_v4 = vpop.f32.mrb[120].mxu1 }
 0x233   : > { %v1848_v51 = vmax.f32 %v1785_v27, 0.0  ;;  %v1153_v19 = vadd.f32 %v4849_v14, %v1152_v57  ;;  %v3293_v48 = vpop.f32.mrb[121].mxu1  ;;  %v3045_v35 = vpop.f32.mrb[165].mxu0 }
 0x235   : > { %1912 = vst.msk [vmem:[%s4860_s21 + $0x90] sm:$0xff] %vm1893_vm2, %v1848_v51  ;;  %v1786_v59 = vadd.f32 %v4913_v6, %v1153_v19 }
 0x236   : > { %v1157_v40 = vpop.f32.mrb[166].mxu0  ;;  %v4973_v52 = vpop.f32.mrb[122].mxu1 }
 0x237   : > { %v1849_v24 = vmax.f32 %v1786_v59, 0.0  ;;  %v1158_v23 = vadd.f32 %v4849_v14, %v1157_v40  ;;  %v3296_v20 = vpop.f32.mrb[123].mxu1  ;;  %v3048_v53 = vpop.f32.mrb[167].mxu0 }
 0x239   : > { %1913 = vst.msk [vmem:[%s4860_s21 + $0x98] sm:$0xff] %vm1893_vm2, %v1849_v24  ;;  %v1787_v0 = vadd.f32 %v4919_v61, %v1158_v23 }
 0x23a   : > { %v1162_v29 = vpop.f32.mrb[168].mxu0  ;;  %v4979_v55 = vpop.f32.mrb[124].mxu1 }
 0x23b   : > { %v1850_v28 = vmax.f32 %v1787_v0, 0.0  ;;  %v1163_v36 = vadd.f32 %v4849_v14, %v1162_v29  ;;  %v3299_v6 = vpop.f32.mrb[125].mxu1  ;;  %v3051_v5 = vpop.f32.mrb[169].mxu0 }
 0x23d   : > { %1914 = vst.msk [vmem:[%s4860_s21 + $0xa0] sm:$0xff] %vm1893_vm2, %v1850_v28  ;;  %v1788_v34 = vadd.f32 %v4925_v31, %v1163_v36 }
 0x23e   : > { %v1167_v38 = vpop.f32.mrb[170].mxu0  ;;  %v1608_v42 = vpop.f32.mrb[0].mxu1 }
 0x23f   : > { %v1851_v7 = vmax.f32 %v1788_v34, 0.0  ;;  %v1168_v61 = vadd.f32 %v4849_v14, %v1167_v38  ;;  %v3498_v37 = vadd.f32 %v4849_v14, %v1608_v42  ;;  %v3302_v45 = vpop.f32.mrb[1].mxu1  ;;  %v3054_v9 = vpop.f32.mrb[171].mxu0 }
 0x241   : > { %1915 = vst.msk [vmem:[%s4860_s21 + $0xa8] sm:$0xff] %vm1893_vm2, %v1851_v7  ;;  %v1789_v47 = vadd.f32 %v4931_v50, %v1168_v61  ;;  %v1861_v63 = vmax.f32 %v3498_v37, 0.0 }
 0x242   : > { %v1172_v41 = vpop.f32.mrb[172].mxu0  ;;  %v1613_v49 = vpop.f32.mrb[2].mxu1 }
 0x243   : > { %v1852_v10 = vmax.f32 %v1789_v47, 0.0  ;;  %1925 = vst.msk [vmem:[%s4860_s21 + $0xf8] sm:$0xff] %vm1893_vm2, %v1861_v63  ;;  %v1173_v31 = vadd.f32 %v4849_v14, %v1172_v41  ;;  %v3499_v18 = vadd.f32 %v4849_v14, %v1613_v49  ;;  %v3305_v44 = vpop.f32.mrb[3].mxu1  ;;  %v3057_v33 = vpop.f32.mrb[173].mxu0 }
 0x245   : > { %1916 = vst.msk [vmem:[%s4860_s21 + $0xb0] sm:$0xff] %vm1893_vm2, %v1852_v10  ;;  %v1790_v56 = vadd.f32 %v4937_v2, %v1173_v31  ;;  %v1862_v50 = vmax.f32 %v3499_v18, 0.0 }
 0x246   : > { %v1177_v60 = vpop.f32.mrb[174].mxu0  ;;  %v1618_v46 = vpop.f32.mrb[4].mxu1 }
 0x247   : > { %v1853_v12 = vmax.f32 %v1790_v56, 0.0  ;;  %1926 = vst.msk [vmem:[%s4860_s21 + $0x100] sm:$0xff] %vm1893_vm2, %v1862_v50  ;;  %v1178_v26 = vadd.f32 %v4849_v14, %v1177_v60  ;;  %v3500_v43 = vadd.f32 %v4849_v14, %v1618_v46  ;;  %v3308_v1 = vpop.f32.mrb[5].mxu1  ;;  %v3060_v30 = vpop.f32.mrb[175].mxu0 }
 0x249   : > { %1917 = vst.msk [vmem:[%s4860_s21 + $0xb8] sm:$0xff] %vm1893_vm2, %v1853_v12  ;;  %v1791_v3 = vadd.f32 %v4943_v62, %v1178_v26  ;;  %v1863_v2 = vmax.f32 %v3500_v43, 0.0 }
 0x24a   : > { %v1182_v8 = vpop.f32.mrb[176].mxu0  ;;  %v1623_v32 = vpop.f32.mrb[6].mxu1 }
 0x24b   : > { %v1854_v16 = vmax.f32 %v1791_v3, 0.0  ;;  %1927 = vst.msk [vmem:[%s4860_s21 + $0x108] sm:$0xff] %vm1893_vm2, %v1863_v2  ;;  %v1183_v13 = vadd.f32 %v4849_v14, %v1182_v8  ;;  %v3501_v17 = vadd.f32 %v4849_v14, %v1623_v32  ;;  %v3311_v39 = vpop.f32.mrb[7].mxu1  ;;  %v3063_v15 = vpop.f32.mrb[177].mxu0 }
 0x24d   : > { %1918 = vst.msk [vmem:[%s4860_s21 + $0xc0] sm:$0xff] %vm1893_vm2, %v1854_v16  ;;  %v1792_v21 = vadd.f32 %v4949_v11, %v1183_v13  ;;  %v1864_v62 = vmax.f32 %v3501_v17, 0.0 }
 0x24e   : > { %v1187_v58 = vpop.f32.mrb[178].mxu0  ;;  %v1628_v25 = vpop.f32.mrb[8].mxu1 }
 0x24f   : > { %v1855_v27 = vmax.f32 %v1792_v21, 0.0  ;;  %1928 = vst.msk [vmem:[%s4860_s21 + $0x110] sm:$0xff] %vm1893_vm2, %v1864_v62  ;;  %v1188_v57 = vadd.f32 %v4849_v14, %v1187_v58  ;;  %v3502_v51 = vadd.f32 %v4849_v14, %v1628_v25  ;;  %v3314_v19 = vpop.f32.mrb[9].mxu1  ;;  %v3066_v48 = vpop.f32.mrb[179].mxu0 }
 0x251   : > { %1919 = vst.msk [vmem:[%s4860_s21 + $0xc8] sm:$0xff] %vm1893_vm2, %v1855_v27  ;;  %v1793_v35 = vadd.f32 %v4955_v54, %v1188_v57  ;;  %v1865_v11 = vmax.f32 %v3502_v51, 0.0 }
 0x252   : > { %v1192_v59 = vpop.f32.mrb[180].mxu0  ;;  %v1633_v40 = vpop.f32.mrb[10].mxu1 }
 0x253   : > { %v1856_v24 = vmax.f32 %v1793_v35, 0.0  ;;  %1929 = vst.msk [vmem:[%s4860_s21 + $0x118] sm:$0xff] %vm1893_vm2, %v1865_v11  ;;  %v1193_v23 = vadd.f32 %v4849_v14, %v1192_v59  ;;  %v3503_v20 = vadd.f32 %v4849_v14, %v1633_v40  ;;  %v3317_v53 = vpop.f32.mrb[11].mxu1  ;;  %v3069_v0 = vpop.f32.mrb[181].mxu0 }
 0x255   : > { %1920 = vst.msk [vmem:[%s4860_s21 + $0xd0] sm:$0xff] %vm1893_vm2, %v1856_v24  ;;  %v1794_v29 = vadd.f32 %v4961_v22, %v1193_v23  ;;  %v1866_v54 = vmax.f32 %v3503_v20, 0.0 }
 0x256   : > { %v1197_v28 = vpop.f32.mrb[182].mxu0  ;;  %v1638_v36 = vpop.f32.mrb[12].mxu1 }
 0x257   : > { %v1857_v6 = vmax.f32 %v1794_v29, 0.0  ;;  %1930 = vst.msk [vmem:[%s4860_s21 + $0x120] sm:$0xff] %vm1893_vm2, %v1866_v54  ;;  %v1198_v5 = vadd.f32 %v4849_v14, %v1197_v28  ;;  %v3504_v34 = vadd.f32 %v4849_v14, %v1638_v36  ;;  %v3320_v38 = vpop.f32.mrb[13].mxu1  ;;  %v3072_v42 = vpop.f32.mrb[183].mxu0 }
 0x259   : > { %1921 = vst.msk [vmem:[%s4860_s21 + $0xd8] sm:$0xff] %vm1893_vm2, %v1857_v6  ;;  %v1795_v7 = vadd.f32 %v4967_v4, %v1198_v5  ;;  %v1867_v22 = vmax.f32 %v3504_v34, 0.0 }
 0x25a   : > { %v1202_v61 = vpop.f32.mrb[184].mxu0  ;;  %v1643_v37 = vpop.f32.mrb[14].mxu1 }
 0x25b   : > { %v1858_v45 = vmax.f32 %v1795_v7, 0.0  ;;  %1931 = vst.msk [vmem:[%s4860_s21 + $0x128] sm:$0xff] %vm1893_vm2, %v1867_v22  ;;  %v1203_v9 = vadd.f32 %v4849_v14, %v1202_v61  ;;  %v3505_v47 = vadd.f32 %v4849_v14, %v1643_v37  ;;  %v3323_v63 = vpop.f32.mrb[15].mxu1  ;;  %v3075_v41 = vpop.f32.mrb[185].mxu0 }
 0x25d   : > { %1922 = vst.msk [vmem:[%s4860_s21 + $0xe0] sm:$0xff] %vm1893_vm2, %v1858_v45  ;;  %v1796_v49 = vadd.f32 %v4973_v52, %v1203_v9  ;;  %v1868_v4 = vmax.f32 %v3505_v47, 0.0 }
 0x25e   : > { %v1207_v10 = vpop.f32.mrb[186].mxu0  ;;  %v1648_v31 = vpop.f32.mrb[16].mxu1 }
 0x25f   : > { %v1859_v18 = vmax.f32 %v1796_v49, 0.0  ;;  %1932 = vst.msk [vmem:[%s4860_s21 + $0x130] sm:$0xff] %vm1893_vm2, %v1868_v4  ;;  %v1208_v44 = vadd.f32 %v4849_v14, %v1207_v10  ;;  %v3506_v33 = vadd.f32 %v4849_v14, %v1648_v31  ;;  %v3326_v56 = vpop.f32.mrb[17].mxu1  ;;  %v3078_v50 = vpop.f32.mrb[187].mxu0 }
 0x261   : > { %1923 = vst.msk [vmem:[%s4860_s21 + $0xe8] sm:$0xff] %vm1893_vm2, %v1859_v18  ;;  %v1797_v60 = vadd.f32 %v4979_v55, %v1208_v44  ;;  %v1869_v52 = vmax.f32 %v3506_v33, 0.0 }
 0x262   : > { %v1653_v46 = vpop.f32.mrb[18].mxu1 }
 0x263   : > { %v1860_v12 = vmax.f32 %v1797_v60, 0.0  ;;  %1933 = vst.msk [vmem:[%s4860_s21 + $0x138] sm:$0xff] %vm1893_vm2, %v1869_v52  ;;  %v3507_v26 = vadd.f32 %v4849_v14, %v1653_v46  ;;  %v3329_v43 = vpop.f32.mrb[19].mxu1 }
 0x265   : > { %1924 = vst.msk [vmem:[%s4860_s21 + $0xf0] sm:$0xff] %vm1893_vm2, %v1860_v12  ;;  %v1870_v1 = vmax.f32 %v3507_v26, 0.0 }
 0x266   : > { %v1658_v30 = vpop.f32.mrb[20].mxu1 }
 0x267   : > { %1934 = vst.msk [vmem:[%s4860_s21 + $0x140] sm:$0xff] %vm1893_vm2, %v1870_v1  ;;  %v3508_v3 = vadd.f32 %v4849_v14, %v1658_v30  ;;  %v3332_v2 = vpop.f32.mrb[21].mxu1 }
 0x269   : > { %v1871_v55 = vmax.f32 %v3508_v3, 0.0 }
 0x26a   : > { %v1663_v8 = vpop.f32.mrb[22].mxu1 }
 0x26b   : > { %1935 = vst.msk [vmem:[%s4860_s21 + $0x148] sm:$0xff] %vm1893_vm2, %v1871_v55  ;;  %v3509_v32 = vadd.f32 %v4849_v14, %v1663_v8  ;;  %v3335_v16 = vpop.f32.mrb[23].mxu1 }
 0x26d   : > { %v1872_v13 = vmax.f32 %v3509_v32, 0.0 }
 0x26e   : > { %v1668_v17 = vpop.f32.mrb[24].mxu1 }
 0x26f   : > { %1936 = vst.msk [vmem:[%s4860_s21 + $0x150] sm:$0xff] %vm1893_vm2, %v1872_v13  ;;  %v3510_v39 = vadd.f32 %v4849_v14, %v1668_v17  ;;  %v3338_v15 = vpop.f32.mrb[25].mxu1 }
 0x271   : > { %v1873_v21 = vmax.f32 %v3510_v39, 0.0 }
 0x272   : > { %v1673_v62 = vpop.f32.mrb[26].mxu1 }
 0x273   : > { %1937 = vst.msk [vmem:[%s4860_s21 + $0x158] sm:$0xff] %vm1893_vm2, %v1873_v21  ;;  %v3511_v58 = vadd.f32 %v4849_v14, %v1673_v62  ;;  %v3341_v25 = vpop.f32.mrb[27].mxu1 }
 0x275   : > { %v1874_v27 = vmax.f32 %v3511_v58, 0.0 }
 0x276   : > { %v1678_v57 = vpop.f32.mrb[28].mxu1 }
 0x277   : > { %1938 = vst.msk [vmem:[%s4860_s21 + $0x160] sm:$0xff] %vm1893_vm2, %v1874_v27  ;;  %v3512_v51 = vadd.f32 %v4849_v14, %v1678_v57  ;;  %v3344_v19 = vpop.f32.mrb[29].mxu1 }
 0x279   : > { %v1875_v48 = vmax.f32 %v3512_v51, 0.0 }
 0x27a   : > { %v1683_v35 = vpop.f32.mrb[30].mxu1 }
 0x27b   : > { %1939 = vst.msk [vmem:[%s4860_s21 + $0x168] sm:$0xff] %vm1893_vm2, %v1875_v48  ;;  %v3513_v11 = vadd.f32 %v4849_v14, %v1683_v35  ;;  %v3347_v59 = vpop.f32.mrb[31].mxu1 }
 0x27d   : > { %v1876_v40 = vmax.f32 %v3513_v11, 0.0 }
 0x27e   : > { %v1688_v24 = vpop.f32.mrb[32].mxu1 }
 0x27f   : > { %1940 = vst.msk [vmem:[%s4860_s21 + $0x170] sm:$0xff] %vm1893_vm2, %v1876_v40  ;;  %v3514_v23 = vadd.f32 %v4849_v14, %v1688_v24  ;;  %v3350_v20 = vpop.f32.mrb[33].mxu1 }
 0x281   : > { %v1877_v53 = vmax.f32 %v3514_v23, 0.0 }
 0x282   : > { %v1693_v0 = vpop.f32.mrb[34].mxu1 }
 0x283   : > { %1941 = vst.msk [vmem:[%s4860_s21 + $0x178] sm:$0xff] %vm1893_vm2, %v1877_v53  ;;  %v3515_v29 = vadd.f32 %v4849_v14, %v1693_v0  ;;  %v3353_v54 = vpop.f32.mrb[35].mxu1 }
 0x285   : > { %v1878_v28 = vmax.f32 %v3515_v29, 0.0 }
 0x286   : > { %v1698_v36 = vpop.f32.mrb[36].mxu1 }
 0x287   : > { %1942 = vst.msk [vmem:[%s4860_s21 + $0x180] sm:$0xff] %vm1893_vm2, %v1878_v28  ;;  %v3516_v6 = vadd.f32 %v4849_v14, %v1698_v36  ;;  %v3356_v5 = vpop.f32.mrb[37].mxu1 }
 0x289   : > { %v1879_v34 = vmax.f32 %v3516_v6, 0.0 }
 0x28a   : > { %v1703_v38 = vpop.f32.mrb[38].mxu1 }
 0x28b   : > { %1943 = vst.msk [vmem:[%s4860_s21 + $0x188] sm:$0xff] %vm1893_vm2, %v1879_v34  ;;  %v3517_v42 = vadd.f32 %v4849_v14, %v1703_v38  ;;  %v3359_v7 = vpop.f32.mrb[39].mxu1 }
 0x28d   : > { %v1880_v22 = vmax.f32 %v3517_v42, 0.0 }
 0x28e   : > { %v1708_v61 = vpop.f32.mrb[40].mxu1 }
 0x28f   : > { %1944 = vst.msk [vmem:[%s4860_s21 + $0x190] sm:$0xff] %vm1893_vm2, %v1880_v22  ;;  %v3518_v37 = vadd.f32 %v4849_v14, %v1708_v61  ;;  %v3362_v45 = vpop.f32.mrb[41].mxu1 }
 0x291   : > { %v1881_v9 = vmax.f32 %v3518_v37, 0.0 }
 0x292   : > { %v1713_v47 = vpop.f32.mrb[42].mxu1 }
 0x293   : > { %1945 = vst.msk [vmem:[%s4860_s21 + $0x198] sm:$0xff] %vm1893_vm2, %v1881_v9  ;;  %v3519_v63 = vadd.f32 %v4849_v14, %v1713_v47  ;;  %v3365_v41 = vpop.f32.mrb[43].mxu1 }
 0x295   : > { %v1882_v49 = vmax.f32 %v3519_v63, 0.0 }
 0x296   : > { %v1718_v4 = vpop.f32.mrb[44].mxu1 }
 0x297   : > { %1946 = vst.msk [vmem:[%s4860_s21 + $0x1a0] sm:$0xff] %vm1893_vm2, %v1882_v49  ;;  %v3520_v10 = vadd.f32 %v4849_v14, %v1718_v4  ;;  %v3368_v31 = vpop.f32.mrb[45].mxu1 }
 0x299   : > { %v1883_v18 = vmax.f32 %v3520_v10, 0.0 }
 0x29a   : > { %v1723_v44 = vpop.f32.mrb[46].mxu1 }
 0x29b   : > { %1947 = vst.msk [vmem:[%s4860_s21 + $0x1a8] sm:$0xff] %vm1893_vm2, %v1883_v18  ;;  %v3521_v33 = vadd.f32 %v4849_v14, %v1723_v44  ;;  %v3371_v56 = vpop.f32.mrb[47].mxu1 }
 0x29d   : > { %v1884_v50 = vmax.f32 %v3521_v33, 0.0 }
 0x29e   : > { %v1728_v60 = vpop.f32.mrb[48].mxu1 }
 0x29f   : > { %1948 = vst.msk [vmem:[%s4860_s21 + $0x1b0] sm:$0xff] %vm1893_vm2, %v1884_v50  ;;  %v3522_v52 = vadd.f32 %v4849_v14, %v1728_v60  ;;  %v3374_v46 = vpop.f32.mrb[49].mxu1 }
 0x2a1   : > { %v1885_v12 = vmax.f32 %v3522_v52, 0.0 }
 0x2a2   : > { %v1733_v26 = vpop.f32.mrb[50].mxu1 }
 0x2a3   : > { %1949 = vst.msk [vmem:[%s4860_s21 + $0x1b8] sm:$0xff] %vm1893_vm2, %v1885_v12  ;;  %v3523_v43 = vadd.f32 %v4849_v14, %v1733_v26  ;;  %v3377_v1 = vpop.f32.mrb[51].mxu1 }
 0x2a5   : > { %v1886_v30 = vmax.f32 %v3523_v43, 0.0 }
 0x2a6   : > { %v1738_v3 = vpop.f32.mrb[52].mxu1 }
 0x2a7   : > { %1950 = vst.msk [vmem:[%s4860_s21 + $0x1c0] sm:$0xff] %vm1893_vm2, %v1886_v30  ;;  %v3524_v2 = vadd.f32 %v4849_v14, %v1738_v3  ;;  %v3380_v55 = vpop.f32.mrb[53].mxu1 }
 0x2a9   : > { %v1887_v8 = vmax.f32 %v3524_v2, 0.0 }
 0x2aa   : > { %v1743_v32 = vpop.f32.mrb[54].mxu1 }
 0x2ab   : > { %1951 = vst.msk [vmem:[%s4860_s21 + $0x1c8] sm:$0xff] %vm1893_vm2, %v1887_v8  ;;  %v3525_v16 = vadd.f32 %v4849_v14, %v1743_v32  ;;  %v3383_v13 = vpop.f32.mrb[55].mxu1 }
 0x2ad   : > { %v1888_v17 = vmax.f32 %v3525_v16, 0.0 }
 0x2ae   : > { %v1748_v39 = vpop.f32.mrb[56].mxu1 }
 0x2af   : > { %1952 = vst.msk [vmem:[%s4860_s21 + $0x1d0] sm:$0xff] %vm1893_vm2, %v1888_v17  ;;  %v3526_v15 = vadd.f32 %v4849_v14, %v1748_v39  ;;  %v3386_v21 = vpop.f32.mrb[57].mxu1 }
 0x2b1   : > { %v1889_v62 = vmax.f32 %v3526_v15, 0.0 }
 0x2b2   : > { %v1753_v58 = vpop.f32.mrb[58].mxu1 }
 0x2b3   : > { %1953 = vst.msk [vmem:[%s4860_s21 + $0x1d8] sm:$0xff] %vm1893_vm2, %v1889_v62  ;;  %v3527_v25 = vadd.f32 %v4849_v14, %v1753_v58  ;;  %v3389_v27 = vpop.f32.mrb[59].mxu1 }
 0x2b5   : > { %v1890_v57 = vmax.f32 %v3527_v25, 0.0 }
 0x2b6   : > { %v1758_v51 = vpop.f32.mrb[60].mxu1 }
 0x2b7   : > { %1954 = vst.msk [vmem:[%s4860_s21 + $0x1e0] sm:$0xff] %vm1893_vm2, %v1890_v57  ;;  %v3528_v19 = vadd.f32 %v4849_v14, %v1758_v51  ;;  %v3392_v48 = vpop.f32.mrb[61].mxu1 }
 0x2b9   : > { %v1891_v35 = vmax.f32 %v3528_v19, 0.0  ;;  %1963 = sbr.rel (!%p3842_p4) target bundleno = 788 (0x314), region = 48 }
 0x2ba   : > { %v1763_v11 = vpop.f32.mrb[62].mxu1 }
 0x2bb   : > { %1955 = vst.msk [vmem:[%s4860_s21 + $0x1e8] sm:$0xff] %vm1893_vm2, %v1891_v35  ;;  %v3529_v59 = vadd.f32 %v4849_v14, %v1763_v11  ;;  %v3395_v40 = vpop.f32.mrb[63].mxu1 }
 0x2bd   : > { %v1892_v24 = vmax.f32 %v3529_v59, 0.0 }
 0x2bf   : > { %1956 = vst.msk [vmem:[%s4860_s21 + $0x1f0] sm:$0xff] %vm1893_vm2, %v1892_v24 }
 0x2c0   : > { %s5335_s16 = smov (!%p1966_p8, %s1965_s16), 63 }
 0x2c1   : > { %s2555_s23 = sshll.u32 %s5335_s16, 7 }
 0x2c2   : > { %p2558_p9 = scmp.eq.s32.totalorder %s2555_s23, 0 }
 0x2c3   : > { %3687 = sdivrem.u32 (!%p2558_p9), %s5335_s16, 63 }
 0x2c4   : > { %1974 = sbr.rel (%p2558_p9) target bundleno = 788 (0x314), region = 52 }
 0x2cc   : > { %s5132_s29 = spop.drf %3687 }
 0x2cd   : > { %p2559_p10 = scmp.le.s32.totalorder %s5132_s29, 0 }
 0x2ce   : > { %s5326_s24 = smov (!%p2559_p10), %s5126_s20  ;;  %s5327_s14 = smov (!%p2559_p10), %s4860_s21 }
 0x2cf   : > { %2378 = sbr.rel (%p2559_p10) target bundleno = 759 (0x2f7), region = 128  ;;  %s5141_s26 = smov (!%p2559_p10), 0  }
 0x2d0   : > { %s5143_s27 = smov (!%p2559_p10), 0  }
 0x2d6 LB: >> { %v2162_v14 = vld [vmem:[%s3753_s14] sm:$0xff]  ;;  %v2164_v23 = vld [vmem:[%s3753_s14 + $0x8] sm:$0xff]  ;;  %v2166_v20 = vld [vmem:[%s3753_s14 + $0x10] sm:$0xff]  ;;  %s2288_s30 = sadd.s32 1, %s3757_s26  ;;  %s2156_s27 = sadd.s32 1, %s3761_s27   ;;  %s3761_s27 = sphi %s5143_s27, %s2156_s27   ;;  %s3757_s26 = sphi %s5141_s26, %s5330_s26   ;;  %s3753_s14 = sphi %s5327_s14, %s5329_s14   ;;  %s3749_s24 = sphi %s5326_s24, %s5328_s24  }
 0x2d7   : >> { %2163 = vst [vmem:[%s3749_s24] sm:$0xff] %v2162_v14  ;;  %2165 = vst [vmem:[%s3749_s24 + $0x8] sm:$0xff] %v2164_v23  ;;  %v2168_v53 = vld [vmem:[%s3753_s14 + $0x18] sm:$0xff]  ;;  %v2170_v0 = vld [vmem:[%s3753_s14 + $0x20] sm:$0xff]  ;;  %p2289_p11 = scmp.ge.s32.totalorder %s2288_s30, %s5132_s29  ;;  %p2155_p12 = scmp.ge.s32.totalorder %s2156_s27, %s5132_s29 }
 0x2d8   : >> { %2167 = vst [vmem:[%s3749_s24 + $0x10] sm:$0xff] %v2166_v20  ;;  %v2172_v29 = vld [vmem:[%s3753_s14 + $0x28] sm:$0xff]  ;;  %2169 = vst [vmem:[%s3749_s24 + $0x18] sm:$0xff] %v2168_v53  ;;  %v2174_v54 = vld [vmem:[%s3753_s14 + $0x30] sm:$0xff] }
 0x2d9   : >> { %2171 = vst [vmem:[%s3749_s24 + $0x20] sm:$0xff] %v2170_v0  ;;  %2173 = vst [vmem:[%s3749_s24 + $0x28] sm:$0xff] %v2172_v29  ;;  %v2176_v28 = vld [vmem:[%s3753_s14 + $0x38] sm:$0xff]  ;;  %v2178_v36 = vld [vmem:[%s3753_s14 + $0x40] sm:$0xff]  ;;  %s5337_s30 = smov (%p2289_p11, %s2288_s30), 0 }
 0x2da   : >> { %2175 = vst [vmem:[%s3749_s24 + $0x30] sm:$0xff] %v2174_v54  ;;  %2177 = vst [vmem:[%s3749_s24 + $0x38] sm:$0xff] %v2176_v28  ;;  %v2180_v6 = vld [vmem:[%s3753_s14 + $0x48] sm:$0xff]  ;;  %v2182_v5 = vld [vmem:[%s3753_s14 + $0x50] sm:$0xff]  ;;  %s2291_s7 = smul.u32 504, %s5337_s30  ;;  %s5330_s26 = smov %s5337_s30 }
 0x2db   : >> { %2179 = vst [vmem:[%s3749_s24 + $0x40] sm:$0xff] %v2178_v36  ;;  %v2184_v34 = vld [vmem:[%s3753_s14 + $0x58] sm:$0xff]  ;;  %2181 = vst [vmem:[%s3749_s24 + $0x48] sm:$0xff] %v2180_v6  ;;  %v2186_v38 = vld [vmem:[%s3753_s14 + $0x60] sm:$0xff] }
 0x2dc   : >> { %2183 = vst [vmem:[%s3749_s24 + $0x50] sm:$0xff] %v2182_v5  ;;  %2185 = vst [vmem:[%s3749_s24 + $0x58] sm:$0xff] %v2184_v34  ;;  %v2188_v42 = vld [vmem:[%s3753_s14 + $0x68] sm:$0xff]  ;;  %v2190_v7 = vld [vmem:[%s3753_s14 + $0x70] sm:$0xff]  ;;  %s5205_s8 = scalar_lea.vmem %s4860_s21, %s2291_s7 [#allocation2]   ;;  %s5208_s9 = scalar_lea.vmem %s5126_s20, %s2291_s7  }
 0x2dd   : >> { %2187 = vst [vmem:[%s3749_s24 + $0x60] sm:$0xff] %v2186_v38  ;;  %2189 = vst [vmem:[%s3749_s24 + $0x68] sm:$0xff] %v2188_v42  ;;  %v2192_v22 = vld [vmem:[%s3753_s14 + $0x78] sm:$0xff]  ;;  %v2194_v61 = vld [vmem:[%s3753_s14 + $0x80] sm:$0xff] }
 0x2de   : >> { %2191 = vst [vmem:[%s3749_s24 + $0x70] sm:$0xff] %v2190_v7  ;;  %v2196_v37 = vld [vmem:[%s3753_s14 + $0x88] sm:$0xff]  ;;  %2193 = vst [vmem:[%s3749_s24 + $0x78] sm:$0xff] %v2192_v22  ;;  %v2198_v45 = vld [vmem:[%s3753_s14 + $0x90] sm:$0xff] }
 0x2df   : >> { %2195 = vst [vmem:[%s3749_s24 + $0x80] sm:$0xff] %v2194_v61  ;;  %2197 = vst [vmem:[%s3749_s24 + $0x88] sm:$0xff] %v2196_v37  ;;  %v2200_v9 = vld [vmem:[%s3753_s14 + $0x98] sm:$0xff]  ;;  %v2202_v47 = vld [vmem:[%s3753_s14 + $0xa0] sm:$0xff] }
 0x2e0   : >> { %2199 = vst [vmem:[%s3749_s24 + $0x90] sm:$0xff] %v2198_v45  ;;  %2201 = vst [vmem:[%s3749_s24 + $0x98] sm:$0xff] %v2200_v9  ;;  %v2204_v63 = vld [vmem:[%s3753_s14 + $0xa8] sm:$0xff]  ;;  %v2206_v41 = vld [vmem:[%s3753_s14 + $0xb0] sm:$0xff] }
 0x2e1   : >> { %2203 = vst [vmem:[%s3749_s24 + $0xa0] sm:$0xff] %v2202_v47  ;;  %v2208_v49 = vld [vmem:[%s3753_s14 + $0xb8] sm:$0xff]  ;;  %2205 = vst [vmem:[%s3749_s24 + $0xa8] sm:$0xff] %v2204_v63  ;;  %v2210_v4 = vld [vmem:[%s3753_s14 + $0xc0] sm:$0xff] }
 0x2e2   : >> { %2207 = vst [vmem:[%s3749_s24 + $0xb0] sm:$0xff] %v2206_v41  ;;  %2209 = vst [vmem:[%s3749_s24 + $0xb8] sm:$0xff] %v2208_v49  ;;  %v2212_v10 = vld [vmem:[%s3753_s14 + $0xc8] sm:$0xff]  ;;  %v2214_v31 = vld [vmem:[%s3753_s14 + $0xd0] sm:$0xff] }
 0x2e3   : >> { %2211 = vst [vmem:[%s3749_s24 + $0xc0] sm:$0xff] %v2210_v4  ;;  %2213 = vst [vmem:[%s3749_s24 + $0xc8] sm:$0xff] %v2212_v10  ;;  %v2216_v18 = vld [vmem:[%s3753_s14 + $0xd8] sm:$0xff]  ;;  %v2218_v44 = vld [vmem:[%s3753_s14 + $0xe0] sm:$0xff] }
 0x2e4   : >> { %2215 = vst [vmem:[%s3749_s24 + $0xd0] sm:$0xff] %v2214_v31  ;;  %v2220_v33 = vld [vmem:[%s3753_s14 + $0xe8] sm:$0xff]  ;;  %2217 = vst [vmem:[%s3749_s24 + $0xd8] sm:$0xff] %v2216_v18  ;;  %v2222_v56 = vld [vmem:[%s3753_s14 + $0xf0] sm:$0xff] }
 0x2e5   : >> { %2219 = vst [vmem:[%s3749_s24 + $0xe0] sm:$0xff] %v2218_v44  ;;  %2221 = vst [vmem:[%s3749_s24 + $0xe8] sm:$0xff] %v2220_v33  ;;  %v2224_v50 = vld [vmem:[%s3753_s14 + $0xf8] sm:$0xff]  ;;  %v2226_v60 = vld [vmem:[%s3753_s14 + $0x100] sm:$0xff] }
 0x2e6   : >> { %2223 = vst [vmem:[%s3749_s24 + $0xf0] sm:$0xff] %v2222_v56  ;;  %2225 = vst [vmem:[%s3749_s24 + $0xf8] sm:$0xff] %v2224_v50  ;;  %v2228_v52 = vld [vmem:[%s3753_s14 + $0x108] sm:$0xff]  ;;  %v2230_v46 = vld [vmem:[%s3753_s14 + $0x110] sm:$0xff] }
 0x2e7   : >> { %2227 = vst [vmem:[%s3749_s24 + $0x100] sm:$0xff] %v2226_v60  ;;  %v2232_v12 = vld [vmem:[%s3753_s14 + $0x118] sm:$0xff]  ;;  %2229 = vst [vmem:[%s3749_s24 + $0x108] sm:$0xff] %v2228_v52  ;;  %v2234_v26 = vld [vmem:[%s3753_s14 + $0x120] sm:$0xff] }
 0x2e8   : >> { %2231 = vst [vmem:[%s3749_s24 + $0x110] sm:$0xff] %v2230_v46  ;;  %2233 = vst [vmem:[%s3749_s24 + $0x118] sm:$0xff] %v2232_v12  ;;  %v2236_v43 = vld [vmem:[%s3753_s14 + $0x128] sm:$0xff]  ;;  %v2238_v1 = vld [vmem:[%s3753_s14 + $0x130] sm:$0xff] }
 0x2e9   : >> { %2235 = vst [vmem:[%s3749_s24 + $0x120] sm:$0xff] %v2234_v26  ;;  %2237 = vst [vmem:[%s3749_s24 + $0x128] sm:$0xff] %v2236_v43  ;;  %v2240_v30 = vld [vmem:[%s3753_s14 + $0x138] sm:$0xff]  ;;  %v2242_v3 = vld [vmem:[%s3753_s14 + $0x140] sm:$0xff] }
 0x2ea   : >> { %2239 = vst [vmem:[%s3749_s24 + $0x130] sm:$0xff] %v2238_v1  ;;  %v2244_v2 = vld [vmem:[%s3753_s14 + $0x148] sm:$0xff]  ;;  %2241 = vst [vmem:[%s3749_s24 + $0x138] sm:$0xff] %v2240_v30  ;;  %v2246_v55 = vld [vmem:[%s3753_s14 + $0x150] sm:$0xff] }
 0x2eb   : >> { %2243 = vst [vmem:[%s3749_s24 + $0x140] sm:$0xff] %v2242_v3  ;;  %2245 = vst [vmem:[%s3749_s24 + $0x148] sm:$0xff] %v2244_v2  ;;  %v2248_v8 = vld [vmem:[%s3753_s14 + $0x158] sm:$0xff]  ;;  %v2250_v32 = vld [vmem:[%s3753_s14 + $0x160] sm:$0xff] }
 0x2ec   : >> { %2247 = vst [vmem:[%s3749_s24 + $0x150] sm:$0xff] %v2246_v55  ;;  %2249 = vst [vmem:[%s3749_s24 + $0x158] sm:$0xff] %v2248_v8  ;;  %v2252_v16 = vld [vmem:[%s3753_s14 + $0x168] sm:$0xff]  ;;  %v2254_v13 = vld [vmem:[%s3753_s14 + $0x170] sm:$0xff] }
 0x2ed   : >> { %2251 = vst [vmem:[%s3749_s24 + $0x160] sm:$0xff] %v2250_v32  ;;  %v2256_v17 = vld [vmem:[%s3753_s14 + $0x178] sm:$0xff]  ;;  %2253 = vst [vmem:[%s3749_s24 + $0x168] sm:$0xff] %v2252_v16  ;;  %v2258_v39 = vld [vmem:[%s3753_s14 + $0x180] sm:$0xff] }
 0x2ee   : >> { %2255 = vst [vmem:[%s3749_s24 + $0x170] sm:$0xff] %v2254_v13  ;;  %2257 = vst [vmem:[%s3749_s24 + $0x178] sm:$0xff] %v2256_v17  ;;  %v2260_v15 = vld [vmem:[%s3753_s14 + $0x188] sm:$0xff]  ;;  %v2262_v21 = vld [vmem:[%s3753_s14 + $0x190] sm:$0xff] }
 0x2ef   : >> { %2259 = vst [vmem:[%s3749_s24 + $0x180] sm:$0xff] %v2258_v39  ;;  %2261 = vst [vmem:[%s3749_s24 + $0x188] sm:$0xff] %v2260_v15  ;;  %v2264_v62 = vld [vmem:[%s3753_s14 + $0x198] sm:$0xff]  ;;  %v2266_v58 = vld [vmem:[%s3753_s14 + $0x1a0] sm:$0xff] }
 0x2f0   : >> { %2263 = vst [vmem:[%s3749_s24 + $0x190] sm:$0xff] %v2262_v21  ;;  %v2268_v25 = vld [vmem:[%s3753_s14 + $0x1a8] sm:$0xff]  ;;  %2265 = vst [vmem:[%s3749_s24 + $0x198] sm:$0xff] %v2264_v62  ;;  %v2270_v27 = vld [vmem:[%s3753_s14 + $0x1b0] sm:$0xff]  ;;  %2158 = sbr.rel (!%p2155_p12) target bundleno = 726 (0x2d6), region = 134 }
 0x2f1   : >> { %2267 = vst [vmem:[%s3749_s24 + $0x1a0] sm:$0xff] %v2266_v58  ;;  %2269 = vst [vmem:[%s3749_s24 + $0x1a8] sm:$0xff] %v2268_v25  ;;  %v2272_v57 = vld [vmem:[%s3753_s14 + $0x1b8] sm:$0xff]  ;;  %v2274_v51 = vld [vmem:[%s3753_s14 + $0x1c0] sm:$0xff] }
 0x2f2   : >> { %2271 = vst [vmem:[%s3749_s24 + $0x1b0] sm:$0xff] %v2270_v27  ;;  %2273 = vst [vmem:[%s3749_s24 + $0x1b8] sm:$0xff] %v2272_v57  ;;  %v2276_v19 = vld [vmem:[%s3753_s14 + $0x1c8] sm:$0xff]  ;;  %v2278_v48 = vld [vmem:[%s3753_s14 + $0x1d0] sm:$0xff] }
 0x2f3   : >> { %2275 = vst [vmem:[%s3749_s24 + $0x1c0] sm:$0xff] %v2274_v51  ;;  %v2280_v35 = vld [vmem:[%s3753_s14 + $0x1d8] sm:$0xff]  ;;  %2277 = vst [vmem:[%s3749_s24 + $0x1c8] sm:$0xff] %v2276_v19  ;;  %v2282_v11 = vld [vmem:[%s3753_s14 + $0x1e0] sm:$0xff] }
 0x2f4   : >> { %2279 = vst [vmem:[%s3749_s24 + $0x1d0] sm:$0xff] %v2278_v48  ;;  %2281 = vst [vmem:[%s3749_s24 + $0x1d8] sm:$0xff] %v2280_v35  ;;  %v2284_v59 = vld [vmem:[%s3753_s14 + $0x1e8] sm:$0xff]  ;;  %v2286_v40 = vld [vmem:[%s3753_s14 + $0x1f0] sm:$0xff]  ;;  %s5329_s14 = smov %s5205_s8 }
 0x2f5   : >> { %2283 = vst [vmem:[%s3749_s24 + $0x1e0] sm:$0xff] %v2282_v11  ;;  %2285 = vst [vmem:[%s3749_s24 + $0x1e8] sm:$0xff] %v2284_v59 }
 0x2f6   : >> { %2287 = vst [vmem:[%s3749_s24 + $0x1f0] sm:$0xff] %v2286_v40  ;;  %s5328_s24 = smov %s5208_s9 }
 0x2f7 PF: > { %3689 = sdivrem.u32 %s5335_s16, 63 }
 0x2f8   : > { %s2560_s10 = smul.u32 504, %s5132_s29 }
 0x2fa   : > { %s2299_s11 = scalar_lea.vmem %s4860_s21, %s2560_s10 [#allocation2]   ;;  %s2301_s12 = scalar_lea.vmem %s5126_s20, %s2560_s10  }
 0x300   : > { %s3690_s13 = spop.drf %3689 }
 0x301   : > { %p2562_p13 = scmp.le.s32.totalorder %s3690_s13, 0 }
 0x302   : > { %s3763_s15 = smov (!%p2562_p13), %s2301_s12   ;;  %s3767_s17 = smov (!%p2562_p13), %s2299_s11  }
 0x303   : > { %2392 = sbr.rel (%p2562_p13) target bundleno = 788 (0x314), region = 139  ;;  %s3771_s18 = smov (!%p2562_p13), 0  }
 0x304   : > { %s3775_s19 = smov (!%p2562_p13), 0  }
 0x30a LB: >> { %v2311_v24 = vld [vmem:[%s3769_s17] sm:$0xff]  ;;  %s2313_s23 = sadd.s32 1, %s3773_s18  ;;  %s2305_s19 = sadd.s32 1, %s3777_s19   ;;  %s3777_s19 = sphi %s3775_s19, %s2305_s19   ;;  %s3773_s18 = sphi %s3771_s18, %s3772_s18   ;;  %s3769_s17 = sphi %s3767_s17, %s2318_s17   ;;  %s3765_s15 = sphi %s3763_s15, %s2319_s15  }
 0x30b   : >> { %2312 = vst [vmem:[%s3765_s15] sm:$0xff] %v2311_v24  ;;  %p2314_p0 = scmp.ge.s32.totalorder %s2313_s23, %s3690_s13  ;;  %p2304_p1 = scmp.ge.s32.totalorder %s2305_s19, %s3690_s13 }
 0x30d   : >> { %s5339_s23 = smov (%p2314_p0, %s2313_s23), 0  ;;  %2307 = sbr.rel (!%p2304_p1) target bundleno = 778 (0x30a), region = 145 }
 0x30e   : >> { %s2563_s21 = sshll.u32 %s5339_s23, 3  ;;  %s3772_s18 = smov %s5339_s23  }
 0x30f   : >> { %s2318_s17 = scalar_lea.vmem %s2299_s11, %s2563_s21 [#allocation2]   ;;  %s2319_s15 = scalar_lea.vmem %s2301_s12, %s2563_s21  }
 0x314 PF: > { %p13_p2 = scmp.ge.s32.totalorder %s3832_s25, 4   ;;  %s5331_s21 = smov %s3741_s22 }
 0x315   : > { %s5332_s22 = smov %s3840_s28  ;;  %s5333_s23 = smov %s3832_s25 }
 0x316   :  { %15 = sbr.rel (!%p13_p2) target bundleno = 2 (0x2), region = 156 }

</bundles_post_ra>
